<compile_context>
chip_gen: v7x
topology: tpu7x:2x2x1
jax: 0.10.0
libtpu: 0.0.40
codegen_flags: <defaults>
</compile_context>

<pallas_src>
import math
import functools

import jax
import jax.numpy as jnp
from jax.experimental import pallas as pl
from jax.experimental.pallas import tpu as pltpu


# ------------------------------------------------------------------
# Fused decoder-layer kernel (self-attn + cross-attn + FFN + 3 LayerNorms)
# ------------------------------------------------------------------

def _decoder_layer_kernel(
    x_ref, mem_ref,
    wqkv_s_ref, bqkv_s_ref, wo_s_ref, bo_s_ref,
    wq_c_ref, bq_c_ref, wkv_c_ref, bkv_c_ref, wo_c_ref, bo_c_ref,
    w1_ref, b1_ref, w2_ref, b2_ref,
    ln1_g_ref, ln1_b_ref, ln2_g_ref, ln2_b_ref, ln3_g_ref, ln3_b_ref,
    o_ref,
    *, num_heads,
):
    L = x_ref.shape[1]
    D = x_ref.shape[2]
    H = num_heads
    Dh = D // H

    x = x_ref[0]        # (L, D)
    mem = mem_ref[0]    # (Ls, D)

    # Causal additive mask generated in-kernel (no HBM traffic, no (B*H,L,L) broadcast).
    row = jax.lax.broadcasted_iota(jnp.int32, (L, L), 0)
    col = jax.lax.broadcasted_iota(jnp.int32, (L, L), 1)
    causal = jnp.where(col <= row, 0.0, -1e9)

    def layer_norm(v, g_ref, b_ref):
        mean = jnp.mean(v, axis=-1, keepdims=True)
        var = jnp.mean(jnp.square(v - mean), axis=-1, keepdims=True)
        inv = jax.lax.rsqrt(var + 1e-5)
        return (v - mean) * inv * g_ref[...] + b_ref[...]

    def mha(q_full, k_full, v_full, wo_ref, bo_ref, mask):
        # q_full: (Lq, D), k_full/v_full: (Lk, D).  Per-head attention without any
        # (B,L,H,Dh) transposes: slice head columns, and fold the head-concat into the
        # output projection via per-head row-blocks of Wo:
        #   concat_h(ctx_h) @ Wo == sum_h ctx_h @ Wo[h*Dh:(h+1)*Dh, :]
        out = jnp.zeros((q_full.shape[0], D), jnp.float32)
        for h in range(H):
            lo = h * Dh
            q = q_full[:, lo:lo + Dh]
            k = k_full[:, lo:lo + Dh]
            v = v_full[:, lo:lo + Dh]
            s = jnp.dot(q, k.T, preferred_element_type=jnp.float32)
            if mask is not None:
                s = s + mask
            s = s - jnp.max(s, axis=-1, keepdims=True)
            p = jnp.exp(s)
            # EUP reciprocal instead of a VALU divide.
            p = p * pl.reciprocal(jnp.sum(p, axis=-1, keepdims=True), approx=True)
            ctx = jnp.dot(p, v, preferred_element_type=jnp.float32)        # (Lq, Dh)
            out = out + jnp.dot(ctx, wo_ref[lo:lo + Dh, :],
                                preferred_element_type=jnp.float32)
        return out + bo_ref[...]

    # --- self-attention: fused QKV projection, 1/sqrt(Dh) already folded into Wq/bq ---
    qkv = jnp.dot(x, wqkv_s_ref[...], preferred_element_type=jnp.float32) + bqkv_s_ref[...]
    sa = mha(qkv[:, :D], qkv[:, D:2 * D], qkv[:, 2 * D:], wo_s_ref, bo_s_ref, causal)
    x = layer_norm(x + sa, ln1_g_ref, ln1_b_ref)          # residual fused into LN

    # --- cross-attention: fused KV projection of memory, scaled Q projection of x ---
    qc = jnp.dot(x, wq_c_ref[...], preferred_element_type=jnp.float32) + bq_c_ref[...]
    kvc = jnp.dot(mem, wkv_c_ref[...], preferred_element_type=jnp.float32) + bkv_c_ref[...]
    ca = mha(qc, kvc[:, :D], kvc[:, D:], wo_c_ref, bo_c_ref, None)
    x = layer_norm(x + ca, ln2_g_ref, ln2_b_ref)

    # --- FFN (ReLU) ---
    h1 = jnp.dot(x, w1_ref[...], preferred_element_type=jnp.float32) + b1_ref[...]
    h1 = jnp.maximum(h1, 0.0)
    ff = jnp.dot(h1, w2_ref[...], preferred_element_type=jnp.float32) + b2_ref[...]
    x = layer_norm(x + ff, ln3_g_ref, ln3_b_ref)

    o_ref[0] = x


def decoder_layer(x, memory, lp, num_heads):
    """Post-LayerNorm decoder layer. One pallas_call; grid over batch (parallel)."""
    B, L, D = x.shape
    Ls = memory.shape[1]
    Dh = D // num_heads
    scale = 1.0 / math.sqrt(Dh)
    sa = lp["self_attn"]
    ca = lp["cross_attn"]

    # Fused / pre-scaled weights (tiny XLA-side prep, traced once under jit).
    wqkv_s = jnp.concatenate([sa["wq"] * scale, sa["wk"], sa["wv"]], axis=1)   # (D, 3D)
    bqkv_s = jnp.concatenate([sa["bq"] * scale, sa["bk"], sa["bv"]])[None, :]  # (1, 3D)
    wq_c = ca["wq"] * scale
    bq_c = (ca["bq"] * scale)[None, :]
    wkv_c = jnp.concatenate([ca["wk"], ca["wv"]], axis=1)                      # (D, 2D)
    bkv_c = jnp.concatenate([ca["bk"], ca["bv"]])[None, :]                     # (1, 2D)

    args = [
        x, memory,
        wqkv_s, bqkv_s, sa["wo"], sa["bo"][None, :],
        wq_c, bq_c, wkv_c, bkv_c, ca["wo"], ca["bo"][None, :],
        lp["w1"], lp["b1"][None, :], lp["w2"], lp["b2"][None, :],
        lp["ln1_g"][None, :], lp["ln1_b"][None, :],
        lp["ln2_g"][None, :], lp["ln2_b"][None, :],
        lp["ln3_g"][None, :], lp["ln3_b"][None, :],
    ]

    # Weights/biases: full block, constant index_map -> resident in VMEM across the grid.
    in_specs = [
        pl.BlockSpec((1, L, D), lambda b: (b, 0, 0)),
        pl.BlockSpec((1, Ls, D), lambda b: (b, 0, 0)),
    ] + [pl.BlockSpec(a.shape, lambda b: (0, 0)) for a in args[2:]]

    return pl.pallas_call(
        functools.partial(_decoder_layer_kernel, num_heads=num_heads),
        out_shape=jax.ShapeDtypeStruct((B, L, D), jnp.float32),
        grid=(B,),
        in_specs=in_specs,
        out_specs=pl.BlockSpec((1, L, D), lambda b: (b, 0, 0)),
        compiler_params=pltpu.CompilerParams(dimension_semantics=("parallel",)),
    )(*args)


# ------------------------------------------------------------------
# Tiled linear (used for the vocab/logits projection)
# ------------------------------------------------------------------

def _tiled_linear_kernel(x_ref, w_ref, b_ref, o_ref, acc_ref):
    @pl.when(pl.program_id(2) == 0)
    def _():
        acc_ref[...] = jnp.zeros_like(acc_ref)

    acc_ref[...] += jnp.dot(x_ref[...], w_ref[...], preferred_element_type=jnp.float32)

    @pl.when(pl.program_id(2) == pl.num_programs(2) - 1)
    def _():
        o_ref[...] = (acc_ref[...] + b_ref[...]).astype(o_ref.dtype)


def _pick_tile(dim, target):
    if dim <= target or dim % target == 0:
        return min(dim, target)
    return dim  # fall back to a single full-extent block


def tiled_linear(x2d, w, b, *, tm=256, tn=256, tk=512):
    """x2d: (M, K), w: (K, N), b: (N,) -> (M, N).  Tile targets sized for v7x 64 MiB VMEM."""
    M, K = x2d.shape
    N = w.shape[1]
    tm = _pick_tile(M, tm)
    tn = _pick_tile(N, tn)
    tk = _pick_tile(K, tk)
    grid = (M // tm, N // tn, K // tk)
    return pl.pallas_call(
        _tiled_linear_kernel,
        out_shape=jax.ShapeDtypeStruct((M, N), jnp.float32),
        grid=grid,
        in_specs=[
            pl.BlockSpec((tm, tk), lambda i, j, k: (i, k)),
            pl.BlockSpec((tk, tn), lambda i, j, k: (k, j)),
            pl.BlockSpec((1, tn), lambda i, j, k: (0, j)),
        ],
        out_specs=pl.BlockSpec((tm, tn), lambda i, j, k: (i, j)),
        scratch_shapes=[pltpu.VMEM((tm, tn), jnp.float32)],
        compiler_params=pltpu.CompilerParams(
            dimension_semantics=("parallel", "parallel", "arbitrary"),
            vmem_limit_bytes=32 * 1024 * 1024,
        ),
    )(x2d, w, b.reshape(1, N))


# ------------------------------------------------------------------
# Model glue (plain JAX): embedding lookup, positional encoding
# ------------------------------------------------------------------

def positional_encoding(L, D):
    pos = jnp.arange(L, dtype=jnp.float32)[:, None]
    div = jnp.exp(jnp.arange(0, D, 2, dtype=jnp.float32) * (-math.log(10000.0) / D))
    pe = jnp.zeros((L, D), jnp.float32)
    pe = pe.at[:, 0::2].set(jnp.sin(pos * div))
    pe = pe.at[:, 1::2].set(jnp.cos(pos * div))
    return pe


def decoder_forward(params, tgt, memory, num_heads):
    """tgt: (B, Lt) int32 token ids, memory: (B, Ls, D) -> logits (B, Lt, V)."""
    B, Lt = tgt.shape
    D = params["token_embed"].shape[1]

    # token embedding (gather is glue) + sqrt(D) scale + sinusoidal positional encoding
    x = jnp.take(params["token_embed"], tgt, axis=0) * math.sqrt(D)
    x = x + positional_encoding(Lt, D)[None, :, :]

    for lp in params["layers"]:
        x = decoder_layer(x, memory, lp, num_heads)

    # final_norm is None in the reference module -> skipped
    logits = tiled_linear(x.reshape(B * Lt, D), params["w_out"], params["b_out"])
    V = params["w_out"].shape[1]
    return logits.reshape(B, Lt, V)


# ------------------------------------------------------------------
# Deterministic parameter initialization (matches shapes of the torch module)
# ------------------------------------------------------------------

def _xavier(key, shape):
    lim = math.sqrt(6.0 / (shape[0] + shape[1]))
    return jax.random.uniform(key, shape, jnp.float32, -lim, lim)


def init_mha_params(key, D):
    ks = jax.random.split(key, 4)
    return {
        "wq": _xavier(ks[0], (D, D)), "bq": jnp.zeros((D,), jnp.float32),
        "wk": _xavier(ks[1], (D, D)), "bk": jnp.zeros((D,), jnp.float32),
        "wv": _xavier(ks[2], (D, D)), "bv": jnp.zeros((D,), jnp.float32),
        "wo": _xavier(ks[3], (D, D)), "bo": jnp.zeros((D,), jnp.float32),
    }


def init_layer_params(key, D, F):
    ks = jax.random.split(key, 4)
    return {
        "self_attn": init_mha_params(ks[0], D),
        "cross_attn": init_mha_params(ks[1], D),
        "w1": _xavier(ks[2], (D, F)), "b1": jnp.zeros((F,), jnp.float32),
        "w2": _xavier(ks[3], (F, D)), "b2": jnp.zeros((D,), jnp.float32),
        "ln1_g": jnp.ones((D,), jnp.float32), "ln1_b": jnp.zeros((D,), jnp.float32),
        "ln2_g": jnp.ones((D,), jnp.float32), "ln2_b": jnp.zeros((D,), jnp.float32),
        "ln3_g": jnp.ones((D,), jnp.float32), "ln3_b": jnp.zeros((D,), jnp.float32),
    }


def init_decoder_params(key, vocab, D, F, num_layers, padding_idx):
    ks = jax.random.split(key, num_layers + 2)
    embed = 0.02 * jax.random.normal(ks[0], (vocab, D), jnp.float32)
    embed = embed.at[padding_idx].set(0.0)  # nn.Embedding padding_idx row is zero
    return {
        "token_embed": embed,
        "layers": [init_layer_params(ks[1 + i], D, F) for i in range(num_layers)],
        "w_out": _xavier(ks[-1], (D, vocab)),
        "b_out": jnp.zeros((vocab,), jnp.float32),
    }


# ------------------------------------------------------------------
# Main
# ------------------------------------------------------------------

if __name__ == "__main__":
    # small shapes consistent with the module
    VOCAB, D, H, F, NUM_LAYERS = 64, 32, 4, 64, 2
    PADDING_IDX = 0
    B, LT, LS = 2, 8, 8

    key = jax.random.PRNGKey(0)
    k_params, k_tgt, k_mem = jax.random.split(key, 3)

    params = init_decoder_params(k_params, VOCAB, D, F, NUM_LAYERS, PADDING_IDX)
    tgt = jax.random.randint(k_tgt, (B, LT), 0, VOCAB, dtype=jnp.int32)
    memory = jax.random.normal(k_mem, (B, LS, D), jnp.float32)

    fwd = jax.jit(functools.partial(decoder_forward, num_heads=H))
    out = fwd(params, tgt, memory)
    jax.block_until_ready(out)

    assert out.shape == (B, LT, VOCAB), out.shape
    assert out.dtype == jnp.float32
    assert bool(jnp.all(jnp.isfinite(out)))
    print("KERNEL_OK")
</pallas_src>

<mosaic_0001>
module attributes {stable_mosaic.version = 11 : i64} {
  func.func @_tiled_linear_kernel(%arg0: i32, %arg1: i32, %arg2: i32, %arg3: memref<16x32xf32, #tpu.memory_space<vmem>>, %arg4: memref<32x64xf32, #tpu.memory_space<vmem>>, %arg5: memref<1x64xf32, #tpu.memory_space<vmem>>, %arg6: memref<16x64xf32, #tpu.memory_space<vmem>>, %arg7: memref<16x64xf32, #tpu.memory_space<vmem>>) attributes {dimension_semantics = [#tpu.dimension_semantics<parallel>, #tpu.dimension_semantics<parallel>, #tpu.dimension_semantics<arbitrary>], iteration_bounds = array<i64: 1, 1, 1>, scalar_prefetch = 0 : i64, scratch_operands = 1 : i64, tpu.core_type = #tpu.core_type<tc>, window_params = [{transform_indices = @transform_0, window_bounds = array<i64: 16, 32>}, {transform_indices = @transform_1, window_bounds = array<i64: 32, 64>}, {transform_indices = @transform_2, window_bounds = array<i64: 1, 64>}, {transform_indices = @transform_3, window_bounds = array<i64: 16, 64>}]} {
    %c0_i32 = arith.constant 0 : i32
    %0 = arith.cmpi eq, %arg2, %c0_i32 : i32
    %1 = arith.extui %0 : i1 to i32
    %c0_i32_0 = arith.constant 0 : i32
    %2 = arith.cmpi ne, %1, %c0_i32_0 : i32
    scf.if %2 {
      %cst_10 = arith.constant 0.000000e+00 : f32
      %12 = vector.broadcast %cst_10 : f32 to vector<16x64xf32>
      %c0_11 = arith.constant 0 : index
      %c0_12 = arith.constant 0 : index
      %13 = vector.load %arg7[%c0_11, %c0_12] : memref<16x64xf32, #tpu.memory_space<vmem>>, vector<16x64xf32>
      tpu.vector_store %arg7[%c0_11, %c0_12], %12 {strides = array<i32>} : memref<16x64xf32, #tpu.memory_space<vmem>>, vector<16x64xf32>,
    } else {
    }
    %c0 = arith.constant 0 : index
    %c0_1 = arith.constant 0 : index
    %3 = vector.load %arg7[%c0, %c0_1] : memref<16x64xf32, #tpu.memory_space<vmem>>, vector<16x64xf32>
    %c0_2 = arith.constant 0 : index
    %c0_3 = arith.constant 0 : index
    %4 = vector.load %arg3[%c0_2, %c0_3] : memref<16x32xf32, #tpu.memory_space<vmem>>, vector<16x32xf32>
    %c0_4 = arith.constant 0 : index
    %c0_5 = arith.constant 0 : index
    %5 = vector.load %arg4[%c0_4, %c0_5] : memref<32x64xf32, #tpu.memory_space<vmem>>, vector<32x64xf32>
    %cst = arith.constant dense<0.000000e+00> : vector<16x64xf32>
    %6 = tpu.matmul %4, %5, %cst {dimension_numbers = #tpu.dot_dimension_numbers<[1], [0], [0], [1], [0, 0, 1, 1], [], []>} : vector<16x32xf32>, vector<32x64xf32>, vector<16x64xf32> -> vector<16x64xf32>
    %7 = arith.addf %3, %6 : vector<16x64xf32>
    %c0_6 = arith.constant 0 : index
    %c0_7 = arith.constant 0 : index
    %8 = vector.load %arg7[%c0_6, %c0_7] : memref<16x64xf32, #tpu.memory_space<vmem>>, vector<16x64xf32>
    tpu.vector_store %arg7[%c0_6, %c0_7], %7 {strides = array<i32>} : memref<16x64xf32, #tpu.memory_space<vmem>>, vector<16x64xf32>,
    %c0_i32_8 = arith.constant 0 : i32
    %9 = arith.cmpi eq, %arg2, %c0_i32_8 : i32
    %10 = arith.extui %9 : i1 to i32
    %c0_i32_9 = arith.constant 0 : i32
    %11 = arith.cmpi ne, %10, %c0_i32_9 : i32
    scf.if %11 {
      %c0_10 = arith.constant 0 : index
      %c0_11 = arith.constant 0 : index
      %12 = vector.load %arg7[%c0_10, %c0_11] : memref<16x64xf32, #tpu.memory_space<vmem>>, vector<16x64xf32>
      %c0_12 = arith.constant 0 : index
      %c0_13 = arith.constant 0 : index
      %13 = vector.load %arg5[%c0_12, %c0_13] : memref<1x64xf32, #tpu.memory_space<vmem>>, vector<1x64xf32>
      %14 = vector.broadcast %13 : vector<1x64xf32> to vector<16x64xf32>
      %15 = arith.addf %12, %14 : vector<16x64xf32>
      %c0_14 = arith.constant 0 : index
      %c0_15 = arith.constant 0 : index
      %16 = vector.load %arg6[%c0_14, %c0_15] : memref<16x64xf32, #tpu.memory_space<vmem>>, vector<16x64xf32>
      tpu.vector_store %arg6[%c0_14, %c0_15], %15 {strides = array<i32>} : memref<16x64xf32, #tpu.memory_space<vmem>>, vector<16x64xf32>,
    } else {
    }
    return
  }
  func.func @transform_0(%arg0: i32, %arg1: i32, %arg2: i32) -> (i32, i32) {
    %c0_i32 = arith.constant 0 : i32
    return %arg0, %arg2 : i32, i32
  }
  func.func @transform_1(%arg0: i32, %arg1: i32, %arg2: i32) -> (i32, i32) {
    %c0_i32 = arith.constant 0 : i32
    return %arg2, %arg1 : i32, i32
  }
  func.func @transform_2(%arg0: i32, %arg1: i32, %arg2: i32) -> (i32, i32) {
    %c0_i32 = arith.constant 0 : i32
    %c0_i32_0 = arith.constant 0 : i32
    return %c0_i32, %arg1 : i32, i32
  }
  func.func @transform_3(%arg0: i32, %arg1: i32, %arg2: i32) -> (i32, i32) {
    %c0_i32 = arith.constant 0 : i32
    return %arg0, %arg1 : i32, i32
  }
}

module attributes {stable_mosaic.version = 11 : i64} {
  func.func @_decoder_layer_kernel(%arg0: i32, %arg1: memref<1x8x32xf32, #tpu.memory_space<vmem>>, %arg2: memref<1x8x32xf32, #tpu.memory_space<vmem>>, %arg3: memref<32x96xf32, #tpu.memory_space<vmem>>, %arg4: memref<1x96xf32, #tpu.memory_space<vmem>>, %arg5: memref<32x32xf32, #tpu.memory_space<vmem>>, %arg6: memref<1x32xf32, #tpu.memory_space<vmem>>, %arg7: memref<32x32xf32, #tpu.memory_space<vmem>>, %arg8: memref<1x32xf32, #tpu.memory_space<vmem>>, %arg9: memref<32x64xf32, #tpu.memory_space<vmem>>, %arg10: memref<1x64xf32, #tpu.memory_space<vmem>>, %arg11: memref<32x32xf32, #tpu.memory_space<vmem>>, %arg12: memref<1x32xf32, #tpu.memory_space<vmem>>, %arg13: memref<32x64xf32, #tpu.memory_space<vmem>>, %arg14: memref<1x64xf32, #tpu.memory_space<vmem>>, %arg15: memref<64x32xf32, #tpu.memory_space<vmem>>, %arg16: memref<1x32xf32, #tpu.memory_space<vmem>>, %arg17: memref<1x32xf32, #tpu.memory_space<vmem>>, %arg18: memref<1x32xf32, #tpu.memory_space<vmem>>, %arg19: memref<1x32xf32, #tpu.memory_space<vmem>>, %arg20: memref<1x32xf32, #tpu.memory_space<vmem>>, %arg21: memref<1x32xf32, #tpu.memory_space<vmem>>, %arg22: memref<1x32xf32, #tpu.memory_space<vmem>>, %arg23: memref<1x8x32xf32, #tpu.memory_space<vmem>>) attributes {dimension_semantics = [#tpu.dimension_semantics<parallel>], iteration_bounds = array<i64: 2>, scalar_prefetch = 0 : i64, scratch_operands = 0 : i64, tpu.core_type = #tpu.core_type<tc>, window_params = [{transform_indices = @transform_0, window_bounds = array<i64: 1, 8, 32>}, {transform_indices = @transform_1, window_bounds = array<i64: 1, 8, 32>}, {pipeline_mode = #tpu.pipeline_mode<synchronous>, transform_indices = @transform_2, window_bounds = array<i64: 32, 96>}, {pipeline_mode = #tpu.pipeline_mode<synchronous>, transform_indices = @transform_3, window_bounds = array<i64: 1, 96>}, {pipeline_mode = #tpu.pipeline_mode<synchronous>, transform_indices = @transform_4, window_bounds = array<i64: 32, 32>}, {pipeline_mode = #tpu.pipeline_mode<synchronous>, transform_indices = @transform_5, window_bounds = array<i64: 1, 32>}, {pipeline_mode = #tpu.pipeline_mode<synchronous>, transform_indices = @transform_6, window_bounds = array<i64: 32, 32>}, {pipeline_mode = #tpu.pipeline_mode<synchronous>, transform_indices = @transform_7, window_bounds = array<i64: 1, 32>}, {pipeline_mode = #tpu.pipeline_mode<synchronous>, transform_indices = @transform_8, window_bounds = array<i64: 32, 64>}, {pipeline_mode = #tpu.pipeline_mode<synchronous>, transform_indices = @transform_9, window_bounds = array<i64: 1, 64>}, {pipeline_mode = #tpu.pipeline_mode<synchronous>, transform_indices = @transform_10, window_bounds = array<i64: 32, 32>}, {pipeline_mode = #tpu.pipeline_mode<synchronous>, transform_indices = @transform_11, window_bounds = array<i64: 1, 32>}, {pipeline_mode = #tpu.pipeline_mode<synchronous>, transform_indices = @transform_12, window_bounds = array<i64: 32, 64>}, {pipeline_mode = #tpu.pipeline_mode<synchronous>, transform_indices = @transform_13, window_bounds = array<i64: 1, 64>}, {pipeline_mode = #tpu.pipeline_mode<synchronous>, transform_indices = @transform_14, window_bounds = array<i64: 64, 32>}, {pipeline_mode = #tpu.pipeline_mode<synchronous>, transform_indices = @transform_15, window_bounds = array<i64: 1, 32>}, {pipeline_mode = #tpu.pipeline_mode<synchronous>, transform_indices = @transform_16, window_bounds = array<i64: 1, 32>}, {pipeline_mode = #tpu.pipeline_mode<synchronous>, transform_indices = @transform_17, window_bounds = array<i64: 1, 32>}, {pipeline_mode = #tpu.pipeline_mode<synchronous>, transform_indices = @transform_18, window_bounds = array<i64: 1, 32>}, {pipeline_mode = #tpu.pipeline_mode<synchronous>, transform_indices = @transform_19, window_bounds = array<i64: 1, 32>}, {pipeline_mode = #tpu.pipeline_mode<synchronous>, transform_indices = @transform_20, window_bounds = array<i64: 1, 32>}, {pipeline_mode = #tpu.pipeline_mode<synchronous>, transform_indices = @transform_21, window_bounds = array<i64: 1, 32>}, {transform_indices = @transform_22, window_bounds = array<i64: 1, 8, 32>}]} {
    %c0 = arith.constant 0 : index
    %c0_0 = arith.constant 0 : index
    %c0_1 = arith.constant 0 : index
    %0 = vector.load %arg1[%c0, %c0_0, %c0_1] : memref<1x8x32xf32, #tpu.memory_space<vmem>>, vector<1x8x32xf32>
    %1 = vector.shape_cast %0 : vector<1x8x32xf32> to vector<8x32xf32>
    %c0_2 = arith.constant 0 : index
    %c0_3 = arith.constant 0 : index
    %c0_4 = arith.constant 0 : index
    %2 = vector.load %arg2[%c0_2, %c0_3, %c0_4] : memref<1x8x32xf32, #tpu.memory_space<vmem>>, vector<1x8x32xf32>
    %3 = vector.shape_cast %2 : vector<1x8x32xf32> to vector<8x32xf32>
    %4 = tpu.iota {dimensions = array<i32: 0>} : vector<8x8xi32>
    %5 = tpu.iota {dimensions = array<i32: 1>} : vector<8x8xi32>
    %6 = arith.cmpi sle, %5, %4 : vector<8x8xi32>
    %cst = arith.constant 0.000000e+00 : f32
    %cst_5 = arith.constant -1.000000e+09 : f32
    %7 = vector.broadcast %cst : f32 to vector<8x8xf32>
    %8 = vector.broadcast %cst_5 : f32 to vector<8x8xf32>
    %9 = arith.select %6, %7, %8 : vector<8x8xi1>, vector<8x8xf32>
    %c0_6 = arith.constant 0 : index
    %c0_7 = arith.constant 0 : index
    %10 = vector.load %arg3[%c0_6, %c0_7] : memref<32x96xf32, #tpu.memory_space<vmem>>, vector<32x96xf32>
    %cst_8 = arith.constant dense<0.000000e+00> : vector<8x96xf32>
    %11 = tpu.matmul %1, %10, %cst_8 {dimension_numbers = #tpu.dot_dimension_numbers<[1], [0], [0], [1], [0, 0, 1, 1], [], []>} : vector<8x32xf32>, vector<32x96xf32>, vector<8x96xf32> -> vector<8x96xf32>
    %c0_9 = arith.constant 0 : index
    %c0_10 = arith.constant 0 : index
    %12 = vector.load %arg4[%c0_9, %c0_10] : memref<1x96xf32, #tpu.memory_space<vmem>>, vector<1x96xf32>
    %13 = vector.broadcast %12 : vector<1x96xf32> to vector<8x96xf32>
    %14 = arith.addf %11, %13 : vector<8x96xf32>
    %15 = vector.extract_strided_slice %14 {offsets = [0, 0], sizes = [8, 32], strides = [1, 1]} : vector<8x96xf32> to vector<8x32xf32>
    %16 = vector.extract_strided_slice %14 {offsets = [0, 32], sizes = [8, 32], strides = [1, 1]} : vector<8x96xf32> to vector<8x32xf32>
    %17 = vector.extract_strided_slice %14 {offsets = [0, 64], sizes = [8, 32], strides = [1, 1]} : vector<8x96xf32> to vector<8x32xf32>
    %cst_11 = arith.constant 0.000000e+00 : f32
    %18 = vector.broadcast %cst_11 : f32 to vector<8x32xf32>
    %19 = vector.extract_strided_slice %15 {offsets = [0, 0], sizes = [8, 8], strides = [1, 1]} : vector<8x32xf32> to vector<8x8xf32>
    %20 = vector.extract_strided_slice %16 {offsets = [0, 0], sizes = [8, 8], strides = [1, 1]} : vector<8x32xf32> to vector<8x8xf32>
    %21 = vector.extract_strided_slice %17 {offsets = [0, 0], sizes = [8, 8], strides = [1, 1]} : vector<8x32xf32> to vector<8x8xf32>
    %22 = tpu.transpose %20, [1, 0] : vector<8x8xf32> -> vector<8x8xf32>
    %cst_12 = arith.constant dense<0.000000e+00> : vector<8x8xf32>
    %23 = tpu.matmul %19, %22, %cst_12 {dimension_numbers = #tpu.dot_dimension_numbers<[1], [0], [0], [1], [0, 0, 1, 1], [], []>} : vector<8x8xf32>, vector<8x8xf32>, vector<8x8xf32> -> vector<8x8xf32>
    %24 = arith.addf %23, %9 : vector<8x8xf32>
    %cst_13 = arith.constant dense<0xFF800000> : vector<8xf32>
    %25 = vector.multi_reduction <maximumf>, %24, %cst_13 [1] : vector<8x8xf32> to vector<8xf32>
    %26 = vector.shape_cast %25 : vector<8xf32> to vector<8x1xf32>
    %27 = vector.broadcast %26 : vector<8x1xf32> to vector<8x8xf32>
    %28 = arith.subf %24, %27 : vector<8x8xf32>
    %29 = math.exp %28 : vector<8x8xf32>
    %cst_14 = arith.constant dense<0.000000e+00> : vector<8xf32>
    %30 = vector.multi_reduction <add>, %29, %cst_14 [1] : vector<8x8xf32> to vector<8xf32>
    %31 = vector.shape_cast %30 : vector<8xf32> to vector<8x1xf32>
    %32 = tpu.reciprocal %31 {approx = true} : vector<8x1xf32> -> vector<8x1xf32>
    %33 = vector.broadcast %32 : vector<8x1xf32> to vector<8x8xf32>
    %34 = arith.mulf %29, %33 : vector<8x8xf32>
    %cst_15 = arith.constant dense<0.000000e+00> : vector<8x8xf32>
    %35 = tpu.matmul %34, %21, %cst_15 {dimension_numbers = #tpu.dot_dimension_numbers<[1], [0], [0], [1], [0, 0, 1, 1], [], []>} : vector<8x8xf32>, vector<8x8xf32>, vector<8x8xf32> -> vector<8x8xf32>
    %c0_16 = arith.constant 0 : index
    %c0_17 = arith.constant 0 : index
    %36 = vector.load %arg5[%c0_16, %c0_17] : memref<32x32xf32, #tpu.memory_space<vmem>>, vector<8x32xf32>
    %cst_18 = arith.constant dense<0.000000e+00> : vector<8x32xf32>
    %37 = tpu.matmul %35, %36, %cst_18 {dimension_numbers = #tpu.dot_dimension_numbers<[1], [0], [0], [1], [0, 0, 1, 1], [], []>} : vector<8x8xf32>, vector<8x32xf32>, vector<8x32xf32> -> vector<8x32xf32>
    %38 = arith.addf %18, %37 : vector<8x32xf32>
    %39 = vector.extract_strided_slice %15 {offsets = [0, 8], sizes = [8, 8], strides = [1, 1]} : vector<8x32xf32> to vector<8x8xf32>
    %40 = vector.extract_strided_slice %16 {offsets = [0, 8], sizes = [8, 8], strides = [1, 1]} : vector<8x32xf32> to vector<8x8xf32>
    %41 = vector.extract_strided_slice %17 {offsets = [0, 8], sizes = [8, 8], strides = [1, 1]} : vector<8x32xf32> to vector<8x8xf32>
    %42 = tpu.transpose %40, [1, 0] : vector<8x8xf32> -> vector<8x8xf32>
    %cst_19 = arith.constant dense<0.000000e+00> : vector<8x8xf32>
    %43 = tpu.matmul %39, %42, %cst_19 {dimension_numbers = #tpu.dot_dimension_numbers<[1], [0], [0], [1], [0, 0, 1, 1], [], []>} : vector<8x8xf32>, vector<8x8xf32>, vector<8x8xf32> -> vector<8x8xf32>
    %44 = arith.addf %43, %9 : vector<8x8xf32>
    %cst_20 = arith.constant dense<0xFF800000> : vector<8xf32>
    %45 = vector.multi_reduction <maximumf>, %44, %cst_20 [1] : vector<8x8xf32> to vector<8xf32>
    %46 = vector.shape_cast %45 : vector<8xf32> to vector<8x1xf32>
    %47 = vector.broadcast %46 : vector<8x1xf32> to vector<8x8xf32>
    %48 = arith.subf %44, %47 : vector<8x8xf32>
    %49 = math.exp %48 : vector<8x8xf32>
    %cst_21 = arith.constant dense<0.000000e+00> : vector<8xf32>
    %50 = vector.multi_reduction <add>, %49, %cst_21 [1] : vector<8x8xf32> to vector<8xf32>
    %51 = vector.shape_cast %50 : vector<8xf32> to vector<8x1xf32>
    %52 = tpu.reciprocal %51 {approx = true} : vector<8x1xf32> -> vector<8x1xf32>
    %53 = vector.broadcast %52 : vector<8x1xf32> to vector<8x8xf32>
    %54 = arith.mulf %49, %53 : vector<8x8xf32>
    %cst_22 = arith.constant dense<0.000000e+00> : vector<8x8xf32>
    %55 = tpu.matmul %54, %41, %cst_22 {dimension_numbers = #tpu.dot_dimension_numbers<[1], [0], [0], [1], [0, 0, 1, 1], [], []>} : vector<8x8xf32>, vector<8x8xf32>, vector<8x8xf32> -> vector<8x8xf32>
    %c8 = arith.constant 8 : index
    %c0_23 = arith.constant 0 : index
    %56 = vector.load %arg5[%c8, %c0_23] : memref<32x32xf32, #tpu.memory_space<vmem>>, vector<8x32xf32>
    %cst_24 = arith.constant dense<0.000000e+00> : vector<8x32xf32>
    %57 = tpu.matmul %55, %56, %cst_24 {dimension_numbers = #tpu.dot_dimension_numbers<[1], [0], [0], [1], [0, 0, 1, 1], [], []>} : vector<8x8xf32>, vector<8x32xf32>, vector<8x32xf32> -> vector<8x32xf32>
    %58 = arith.addf %38, %57 : vector<8x32xf32>
    %59 = vector.extract_strided_slice %15 {offsets = [0, 16], sizes = [8, 8], strides = [1, 1]} : vector<8x32xf32> to vector<8x8xf32>
    %60 = vector.extract_strided_slice %16 {offsets = [0, 16], sizes = [8, 8], strides = [1, 1]} : vector<8x32xf32> to vector<8x8xf32>
    %61 = vector.extract_strided_slice %17 {offsets = [0, 16], sizes = [8, 8], strides = [1, 1]} : vector<8x32xf32> to vector<8x8xf32>
    %62 = tpu.transpose %60, [1, 0] : vector<8x8xf32> -> vector<8x8xf32>
    %cst_25 = arith.constant dense<0.000000e+00> : vector<8x8xf32>
    %63 = tpu.matmul %59, %62, %cst_25 {dimension_numbers = #tpu.dot_dimension_numbers<[1], [0], [0], [1], [0, 0, 1, 1], [], []>} : vector<8x8xf32>, vector<8x8xf32>, vector<8x8xf32> -> vector<8x8xf32>
    %64 = arith.addf %63, %9 : vector<8x8xf32>
    %cst_26 = arith.constant dense<0xFF800000> : vector<8xf32>
    %65 = vector.multi_reduction <maximumf>, %64, %cst_26 [1] : vector<8x8xf32> to vector<8xf32>
    %66 = vector.shape_cast %65 : vector<8xf32> to vector<8x1xf32>
    %67 = vector.broadcast %66 : vector<8x1xf32> to vector<8x8xf32>
    %68 = arith.subf %64, %67 : vector<8x8xf32>
    %69 = math.exp %68 : vector<8x8xf32>
    %cst_27 = arith.constant dense<0.000000e+00> : vector<8xf32>
    %70 = vector.multi_reduction <add>, %69, %cst_27 [1] : vector<8x8xf32> to vector<8xf32>
    %71 = vector.shape_cast %70 : vector<8xf32> to vector<8x1xf32>
    %72 = tpu.reciprocal %71 {approx = true} : vector<8x1xf32> -> vector<8x1xf32>
    %73 = vector.broadcast %72 : vector<8x1xf32> to vector<8x8xf32>
    %74 = arith.mulf %69, %73 : vector<8x8xf32>
    %cst_28 = arith.constant dense<0.000000e+00> : vector<8x8xf32>
    %75 = tpu.matmul %74, %61, %cst_28 {dimension_numbers = #tpu.dot_dimension_numbers<[1], [0], [0], [1], [0, 0, 1, 1], [], []>} : vector<8x8xf32>, vector<8x8xf32>, vector<8x8xf32> -> vector<8x8xf32>
    %c16 = arith.constant 16 : index
    %c0_29 = arith.constant 0 : index
    %76 = vector.load %arg5[%c16, %c0_29] : memref<32x32xf32, #tpu.memory_space<vmem>>, vector<8x32xf32>
    %cst_30 = arith.constant dense<0.000000e+00> : vector<8x32xf32>
    %77 = tpu.matmul %75, %76, %cst_30 {dimension_numbers = #tpu.dot_dimension_numbers<[1], [0], [0], [1], [0, 0, 1, 1], [], []>} : vector<8x8xf32>, vector<8x32xf32>, vector<8x32xf32> -> vector<8x32xf32>
    %78 = arith.addf %58, %77 : vector<8x32xf32>
    %79 = vector.extract_strided_slice %15 {offsets = [0, 24], sizes = [8, 8], strides = [1, 1]} : vector<8x32xf32> to vector<8x8xf32>
    %80 = vector.extract_strided_slice %16 {offsets = [0, 24], sizes = [8, 8], strides = [1, 1]} : vector<8x32xf32> to vector<8x8xf32>
    %81 = vector.extract_strided_slice %17 {offsets = [0, 24], sizes = [8, 8], strides = [1, 1]} : vector<8x32xf32> to vector<8x8xf32>
    %82 = tpu.transpose %80, [1, 0] : vector<8x8xf32> -> vector<8x8xf32>
    %cst_31 = arith.constant dense<0.000000e+00> : vector<8x8xf32>
    %83 = tpu.matmul %79, %82, %cst_31 {dimension_numbers = #tpu.dot_dimension_numbers<[1], [0], [0], [1], [0, 0, 1, 1], [], []>} : vector<8x8xf32>, vector<8x8xf32>, vector<8x8xf32> -> vector<8x8xf32>
    %84 = arith.addf %83, %9 : vector<8x8xf32>
    %cst_32 = arith.constant dense<0xFF800000> : vector<8xf32>
    %85 = vector.multi_reduction <maximumf>, %84, %cst_32 [1] : vector<8x8xf32> to vector<8xf32>
    %86 = vector.shape_cast %85 : vector<8xf32> to vector<8x1xf32>
    %87 = vector.broadcast %86 : vector<8x1xf32> to vector<8x8xf32>
    %88 = arith.subf %84, %87 : vector<8x8xf32>
    %89 = math.exp %88 : vector<8x8xf32>
    %cst_33 = arith.constant dense<0.000000e+00> : vector<8xf32>
    %90 = vector.multi_reduction <add>, %89, %cst_33 [1] : vector<8x8xf32> to vector<8xf32>
    %91 = vector.shape_cast %90 : vector<8xf32> to vector<8x1xf32>
    %92 = tpu.reciprocal %91 {approx = true} : vector<8x1xf32> -> vector<8x1xf32>
    %93 = vector.broadcast %92 : vector<8x1xf32> to vector<8x8xf32>
    %94 = arith.mulf %89, %93 : vector<8x8xf32>
    %cst_34 = arith.constant dense<0.000000e+00> : vector<8x8xf32>
    %95 = tpu.matmul %94, %81, %cst_34 {dimension_numbers = #tpu.dot_dimension_numbers<[1], [0], [0], [1], [0, 0, 1, 1], [], []>} : vector<8x8xf32>, vector<8x8xf32>, vector<8x8xf32> -> vector<8x8xf32>
    %c24 = arith.constant 24 : index
    %c0_35 = arith.constant 0 : index
    %96 = vector.load %arg5[%c24, %c0_35] : memref<32x32xf32, #tpu.memory_space<vmem>>, vector<8x32xf32>
    %cst_36 = arith.constant dense<0.000000e+00> : vector<8x32xf32>
    %97 = tpu.matmul %95, %96, %cst_36 {dimension_numbers = #tpu.dot_dimension_numbers<[1], [0], [0], [1], [0, 0, 1, 1], [], []>} : vector<8x8xf32>, vector<8x32xf32>, vector<8x32xf32> -> vector<8x32xf32>
    %98 = arith.addf %78, %97 : vector<8x32xf32>
    %c0_37 = arith.constant 0 : index
    %c0_38 = arith.constant 0 : index
    %99 = vector.load %arg6[%c0_37, %c0_38] : memref<1x32xf32, #tpu.memory_space<vmem>>, vector<1x32xf32>
    %100 = vector.broadcast %99 : vector<1x32xf32> to vector<8x32xf32>
    %101 = arith.addf %98, %100 : vector<8x32xf32>
    %102 = arith.addf %1, %101 : vector<8x32xf32>
    %cst_39 = arith.constant dense<0.000000e+00> : vector<8xf32>
    %103 = vector.multi_reduction <add>, %102, %cst_39 [1] : vector<8x32xf32> to vector<8xf32>
    %104 = vector.shape_cast %103 : vector<8xf32> to vector<8x1xf32>
    %cst_40 = arith.constant 3.200000e+01 : f32
    %105 = vector.broadcast %cst_40 : f32 to vector<8x1xf32>
    %106 = arith.divf %104, %105 : vector<8x1xf32>
    %107 = vector.broadcast %106 : vector<8x1xf32> to vector<8x32xf32>
    %108 = arith.subf %102, %107 : vector<8x32xf32>
    %109 = arith.mulf %108, %108 : vector<8x32xf32>
    %cst_41 = arith.constant dense<0.000000e+00> : vector<8xf32>
    %110 = vector.multi_reduction <add>, %109, %cst_41 [1] : vector<8x32xf32> to vector<8xf32>
    %111 = vector.shape_cast %110 : vector<8xf32> to vector<8x1xf32>
    %cst_42 = arith.constant 3.200000e+01 : f32
    %112 = vector.broadcast %cst_42 : f32 to vector<8x1xf32>
    %113 = arith.divf %111, %112 : vector<8x1xf32>
    %cst_43 = arith.constant 9.99999974E-6 : f32
    %114 = vector.broadcast %cst_43 : f32 to vector<8x1xf32>
    %115 = arith.addf %113, %114 : vector<8x1xf32>
    %116 = math.rsqrt %115 : vector<8x1xf32>
    %117 = vector.broadcast %106 : vector<8x1xf32> to vector<8x32xf32>
    %118 = arith.subf %102, %117 : vector<8x32xf32>
    %119 = vector.broadcast %116 : vector<8x1xf32> to vector<8x32xf32>
    %120 = arith.mulf %118, %119 : vector<8x32xf32>
    %c0_44 = arith.constant 0 : index
    %c0_45 = arith.constant 0 : index
    %121 = vector.load %arg17[%c0_44, %c0_45] : memref<1x32xf32, #tpu.memory_space<vmem>>, vector<1x32xf32>
    %122 = vector.broadcast %121 : vector<1x32xf32> to vector<8x32xf32>
    %123 = arith.mulf %120, %122 : vector<8x32xf32>
    %c0_46 = arith.constant 0 : index
    %c0_47 = arith.constant 0 : index
    %124 = vector.load %arg18[%c0_46, %c0_47] : memref<1x32xf32, #tpu.memory_space<vmem>>, vector<1x32xf32>
    %125 = vector.broadcast %124 : vector<1x32xf32> to vector<8x32xf32>
    %126 = arith.addf %123, %125 : vector<8x32xf32>
    %c0_48 = arith.constant 0 : index
    %c0_49 = arith.constant 0 : index
    %127 = vector.load %arg7[%c0_48, %c0_49] : memref<32x32xf32, #tpu.memory_space<vmem>>, vector<32x32xf32>
    %cst_50 = arith.constant dense<0.000000e+00> : vector<8x32xf32>
    %128 = tpu.matmul %126, %127, %cst_50 {dimension_numbers = #tpu.dot_dimension_numbers<[1], [0], [0], [1], [0, 0, 1, 1], [], []>} : vector<8x32xf32>, vector<32x32xf32>, vector<8x32xf32> -> vector<8x32xf32>
    %c0_51 = arith.constant 0 : index
    %c0_52 = arith.constant 0 : index
    %129 = vector.load %arg8[%c0_51, %c0_52] : memref<1x32xf32, #tpu.memory_space<vmem>>, vector<1x32xf32>
    %130 = vector.broadcast %129 : vector<1x32xf32> to vector<8x32xf32>
    %131 = arith.addf %128, %130 : vector<8x32xf32>
    %c0_53 = arith.constant 0 : index
    %c0_54 = arith.constant 0 : index
    %132 = vector.load %arg9[%c0_53, %c0_54] : memref<32x64xf32, #tpu.memory_space<vmem>>, vector<32x64xf32>
    %cst_55 = arith.constant dense<0.000000e+00> : vector<8x64xf32>
    %133 = tpu.matmul %3, %132, %cst_55 {dimension_numbers = #tpu.dot_dimension_numbers<[1], [0], [0], [1], [0, 0, 1, 1], [], []>} : vector<8x32xf32>, vector<32x64xf32>, vector<8x64xf32> -> vector<8x64xf32>
    %c0_56 = arith.constant 0 : index
    %c0_57 = arith.constant 0 : index
    %134 = vector.load %arg10[%c0_56, %c0_57] : memref<1x64xf32, #tpu.memory_space<vmem>>, vector<1x64xf32>
    %135 = vector.broadcast %134 : vector<1x64xf32> to vector<8x64xf32>
    %136 = arith.addf %133, %135 : vector<8x64xf32>
    %137 = vector.extract_strided_slice %136 {offsets = [0, 0], sizes = [8, 32], strides = [1, 1]} : vector<8x64xf32> to vector<8x32xf32>
    %138 = vector.extract_strided_slice %136 {offsets = [0, 32], sizes = [8, 32], strides = [1, 1]} : vector<8x64xf32> to vector<8x32xf32>
    %cst_58 = arith.constant 0.000000e+00 : f32
    %139 = vector.broadcast %cst_58 : f32 to vector<8x32xf32>
    %140 = vector.extract_strided_slice %131 {offsets = [0, 0], sizes = [8, 8], strides = [1, 1]} : vector<8x32xf32> to vector<8x8xf32>
    %141 = vector.extract_strided_slice %137 {offsets = [0, 0], sizes = [8, 8], strides = [1, 1]} : vector<8x32xf32> to vector<8x8xf32>
    %142 = vector.extract_strided_slice %138 {offsets = [0, 0], sizes = [8, 8], strides = [1, 1]} : vector<8x32xf32> to vector<8x8xf32>
    %143 = tpu.transpose %141, [1, 0] : vector<8x8xf32> -> vector<8x8xf32>
    %cst_59 = arith.constant dense<0.000000e+00> : vector<8x8xf32>
    %144 = tpu.matmul %140, %143, %cst_59 {dimension_numbers = #tpu.dot_dimension_numbers<[1], [0], [0], [1], [0, 0, 1, 1], [], []>} : vector<8x8xf32>, vector<8x8xf32>, vector<8x8xf32> -> vector<8x8xf32>
    %cst_60 = arith.constant dense<0xFF800000> : vector<8xf32>
    %145 = vector.multi_reduction <maximumf>, %144, %cst_60 [1] : vector<8x8xf32> to vector<8xf32>
    %146 = vector.shape_cast %145 : vector<8xf32> to vector<8x1xf32>
    %147 = vector.broadcast %146 : vector<8x1xf32> to vector<8x8xf32>
    %148 = arith.subf %144, %147 : vector<8x8xf32>
    %149 = math.exp %148 : vector<8x8xf32>
    %cst_61 = arith.constant dense<0.000000e+00> : vector<8xf32>
    %150 = vector.multi_reduction <add>, %149, %cst_61 [1] : vector<8x8xf32> to vector<8xf32>
    %151 = vector.shape_cast %150 : vector<8xf32> to vector<8x1xf32>
    %152 = tpu.reciprocal %151 {approx = true} : vector<8x1xf32> -> vector<8x1xf32>
    %153 = vector.broadcast %152 : vector<8x1xf32> to vector<8x8xf32>
    %154 = arith.mulf %149, %153 : vector<8x8xf32>
    %cst_62 = arith.constant dense<0.000000e+00> : vector<8x8xf32>
    %155 = tpu.matmul %154, %142, %cst_62 {dimension_numbers = #tpu.dot_dimension_numbers<[1], [0], [0], [1], [0, 0, 1, 1], [], []>} : vector<8x8xf32>, vector<8x8xf32>, vector<8x8xf32> -> vector<8x8xf32>
    %c0_63 = arith.constant 0 : index
    %c0_64 = arith.constant 0 : index
    %156 = vector.load %arg11[%c0_63, %c0_64] : memref<32x32xf32, #tpu.memory_space<vmem>>, vector<8x32xf32>
    %cst_65 = arith.constant dense<0.000000e+00> : vector<8x32xf32>
    %157 = tpu.matmul %155, %156, %cst_65 {dimension_numbers = #tpu.dot_dimension_numbers<[1], [0], [0], [1], [0, 0, 1, 1], [], []>} : vector<8x8xf32>, vector<8x32xf32>, vector<8x32xf32> -> vector<8x32xf32>
    %158 = arith.addf %139, %157 : vector<8x32xf32>
    %159 = vector.extract_strided_slice %131 {offsets = [0, 8], sizes = [8, 8], strides = [1, 1]} : vector<8x32xf32> to vector<8x8xf32>
    %160 = vector.extract_strided_slice %137 {offsets = [0, 8], sizes = [8, 8], strides = [1, 1]} : vector<8x32xf32> to vector<8x8xf32>
    %161 = vector.extract_strided_slice %138 {offsets = [0, 8], sizes = [8, 8], strides = [1, 1]} : vector<8x32xf32> to vector<8x8xf32>
    %162 = tpu.transpose %160, [1, 0] : vector<8x8xf32> -> vector<8x8xf32>
    %cst_66 = arith.constant dense<0.000000e+00> : vector<8x8xf32>
    %163 = tpu.matmul %159, %162, %cst_66 {dimension_numbers = #tpu.dot_dimension_numbers<[1], [0], [0], [1], [0, 0, 1, 1], [], []>} : vector<8x8xf32>, vector<8x8xf32>, vector<8x8xf32> -> vector<8x8xf32>
    %cst_67 = arith.constant dense<0xFF800000> : vector<8xf32>
    %164 = vector.multi_reduction <maximumf>, %163, %cst_67 [1] : vector<8x8xf32> to vector<8xf32>
    %165 = vector.shape_cast %164 : vector<8xf32> to vector<8x1xf32>
    %166 = vector.broadcast %165 : vector<8x1xf32> to vector<8x8xf32>
    %167 = arith.subf %163, %166 : vector<8x8xf32>
    %168 = math.exp %167 : vector<8x8xf32>
    %cst_68 = arith.constant dense<0.000000e+00> : vector<8xf32>
    %169 = vector.multi_reduction <add>, %168, %cst_68 [1] : vector<8x8xf32> to vector<8xf32>
    %170 = vector.shape_cast %169 : vector<8xf32> to vector<8x1xf32>
    %171 = tpu.reciprocal %170 {approx = true} : vector<8x1xf32> -> vector<8x1xf32>
    %172 = vector.broadcast %171 : vector<8x1xf32> to vector<8x8xf32>
    %173 = arith.mulf %168, %172 : vector<8x8xf32>
    %cst_69 = arith.constant dense<0.000000e+00> : vector<8x8xf32>
    %174 = tpu.matmul %173, %161, %cst_69 {dimension_numbers = #tpu.dot_dimension_numbers<[1], [0], [0], [1], [0, 0, 1, 1], [], []>} : vector<8x8xf32>, vector<8x8xf32>, vector<8x8xf32> -> vector<8x8xf32>
    %c8_70 = arith.constant 8 : index
    %c0_71 = arith.constant 0 : index
    %175 = vector.load %arg11[%c8_70, %c0_71] : memref<32x32xf32, #tpu.memory_space<vmem>>, vector<8x32xf32>
    %cst_72 = arith.constant dense<0.000000e+00> : vector<8x32xf32>
    %176 = tpu.matmul %174, %175, %cst_72 {dimension_numbers = #tpu.dot_dimension_numbers<[1], [0], [0], [1], [0, 0, 1, 1], [], []>} : vector<8x8xf32>, vector<8x32xf32>, vector<8x32xf32> -> vector<8x32xf32>
    %177 = arith.addf %158, %176 : vector<8x32xf32>
    %178 = vector.extract_strided_slice %131 {offsets = [0, 16], sizes = [8, 8], strides = [1, 1]} : vector<8x32xf32> to vector<8x8xf32>
    %179 = vector.extract_strided_slice %137 {offsets = [0, 16], sizes = [8, 8], strides = [1, 1]} : vector<8x32xf32> to vector<8x8xf32>
    %180 = vector.extract_strided_slice %138 {offsets = [0, 16], sizes = [8, 8], strides = [1, 1]} : vector<8x32xf32> to vector<8x8xf32>
    %181 = tpu.transpose %179, [1, 0] : vector<8x8xf32> -> vector<8x8xf32>
    %cst_73 = arith.constant dense<0.000000e+00> : vector<8x8xf32>
    %182 = tpu.matmul %178, %181, %cst_73 {dimension_numbers = #tpu.dot_dimension_numbers<[1], [0], [0], [1], [0, 0, 1, 1], [], []>} : vector<8x8xf32>, vector<8x8xf32>, vector<8x8xf32> -> vector<8x8xf32>
    %cst_74 = arith.constant dense<0xFF800000> : vector<8xf32>
    %183 = vector.multi_reduction <maximumf>, %182, %cst_74 [1] : vector<8x8xf32> to vector<8xf32>
    %184 = vector.shape_cast %183 : vector<8xf32> to vector<8x1xf32>
    %185 = vector.broadcast %184 : vector<8x1xf32> to vector<8x8xf32>
    %186 = arith.subf %182, %185 : vector<8x8xf32>
    %187 = math.exp %186 : vector<8x8xf32>
    %cst_75 = arith.constant dense<0.000000e+00> : vector<8xf32>
    %188 = vector.multi_reduction <add>, %187, %cst_75 [1] : vector<8x8xf32> to vector<8xf32>
    %189 = vector.shape_cast %188 : vector<8xf32> to vector<8x1xf32>
    %190 = tpu.reciprocal %189 {approx = true} : vector<8x1xf32> -> vector<8x1xf32>
    %191 = vector.broadcast %190 : vector<8x1xf32> to vector<8x8xf32>
    %192 = arith.mulf %187, %191 : vector<8x8xf32>
    %cst_76 = arith.constant dense<0.000000e+00> : vector<8x8xf32>
    %193 = tpu.matmul %192, %180, %cst_76 {dimension_numbers = #tpu.dot_dimension_numbers<[1], [0], [0], [1], [0, 0, 1, 1], [], []>} : vector<8x8xf32>, vector<8x8xf32>, vector<8x8xf32> -> vector<8x8xf32>
    %c16_77 = arith.constant 16 : index
    %c0_78 = arith.constant 0 : index
    %194 = vector.load %arg11[%c16_77, %c0_78] : memref<32x32xf32, #tpu.memory_space<vmem>>, vector<8x32xf32>
    %cst_79 = arith.constant dense<0.000000e+00> : vector<8x32xf32>
    %195 = tpu.matmul %193, %194, %cst_79 {dimension_numbers = #tpu.dot_dimension_numbers<[1], [0], [0], [1], [0, 0, 1, 1], [], []>} : vector<8x8xf32>, vector<8x32xf32>, vector<8x32xf32> -> vector<8x32xf32>
    %196 = arith.addf %177, %195 : vector<8x32xf32>
    %197 = vector.extract_strided_slice %131 {offsets = [0, 24], sizes = [8, 8], strides = [1, 1]} : vector<8x32xf32> to vector<8x8xf32>
    %198 = vector.extract_strided_slice %137 {offsets = [0, 24], sizes = [8, 8], strides = [1, 1]} : vector<8x32xf32> to vector<8x8xf32>
    %199 = vector.extract_strided_slice %138 {offsets = [0, 24], sizes = [8, 8], strides = [1, 1]} : vector<8x32xf32> to vector<8x8xf32>
    %200 = tpu.transpose %198, [1, 0] : vector<8x8xf32> -> vector<8x8xf32>
    %cst_80 = arith.constant dense<0.000000e+00> : vector<8x8xf32>
    %201 = tpu.matmul %197, %200, %cst_80 {dimension_numbers = #tpu.dot_dimension_numbers<[1], [0], [0], [1], [0, 0, 1, 1], [], []>} : vector<8x8xf32>, vector<8x8xf32>, vector<8x8xf32> -> vector<8x8xf32>
    %cst_81 = arith.constant dense<0xFF800000> : vector<8xf32>
    %202 = vector.multi_reduction <maximumf>, %201, %cst_81 [1] : vector<8x8xf32> to vector<8xf32>
    %203 = vector.shape_cast %202 : vector<8xf32> to vector<8x1xf32>
    %204 = vector.broadcast %203 : vector<8x1xf32> to vector<8x8xf32>
    %205 = arith.subf %201, %204 : vector<8x8xf32>
    %206 = math.exp %205 : vector<8x8xf32>
    %cst_82 = arith.constant dense<0.000000e+00> : vector<8xf32>
    %207 = vector.multi_reduction <add>, %206, %cst_82 [1] : vector<8x8xf32> to vector<8xf32>
    %208 = vector.shape_cast %207 : vector<8xf32> to vector<8x1xf32>
    %209 = tpu.reciprocal %208 {approx = true} : vector<8x1xf32> -> vector<8x1xf32>
    %210 = vector.broadcast %209 : vector<8x1xf32> to vector<8x8xf32>
    %211 = arith.mulf %206, %210 : vector<8x8xf32>
    %cst_83 = arith.constant dense<0.000000e+00> : vector<8x8xf32>
    %212 = tpu.matmul %211, %199, %cst_83 {dimension_numbers = #tpu.dot_dimension_numbers<[1], [0], [0], [1], [0, 0, 1, 1], [], []>} : vector<8x8xf32>, vector<8x8xf32>, vector<8x8xf32> -> vector<8x8xf32>
    %c24_84 = arith.constant 24 : index
    %c0_85 = arith.constant 0 : index
    %213 = vector.load %arg11[%c24_84, %c0_85] : memref<32x32xf32, #tpu.memory_space<vmem>>, vector<8x32xf32>
    %cst_86 = arith.constant dense<0.000000e+00> : vector<8x32xf32>
    %214 = tpu.matmul %212, %213, %cst_86 {dimension_numbers = #tpu.dot_dimension_numbers<[1], [0], [0], [1], [0, 0, 1, 1], [], []>} : vector<8x8xf32>, vector<8x32xf32>, vector<8x32xf32> -> vector<8x32xf32>
    %215 = arith.addf %196, %214 : vector<8x32xf32>
    %c0_87 = arith.constant 0 : index
    %c0_88 = arith.constant 0 : index
    %216 = vector.load %arg12[%c0_87, %c0_88] : memref<1x32xf32, #tpu.memory_space<vmem>>, vector<1x32xf32>
    %217 = vector.broadcast %216 : vector<1x32xf32> to vector<8x32xf32>
    %218 = arith.addf %215, %217 : vector<8x32xf32>
    %219 = arith.addf %126, %218 : vector<8x32xf32>
    %cst_89 = arith.constant dense<0.000000e+00> : vector<8xf32>
    %220 = vector.multi_reduction <add>, %219, %cst_89 [1] : vector<8x32xf32> to vector<8xf32>
    %221 = vector.shape_cast %220 : vector<8xf32> to vector<8x1xf32>
    %cst_90 = arith.constant 3.200000e+01 : f32
    %222 = vector.broadcast %cst_90 : f32 to vector<8x1xf32>
    %223 = arith.divf %221, %222 : vector<8x1xf32>
    %224 = vector.broadcast %223 : vector<8x1xf32> to vector<8x32xf32>
    %225 = arith.subf %219, %224 : vector<8x32xf32>
    %226 = arith.mulf %225, %225 : vector<8x32xf32>
    %cst_91 = arith.constant dense<0.000000e+00> : vector<8xf32>
    %227 = vector.multi_reduction <add>, %226, %cst_91 [1] : vector<8x32xf32> to vector<8xf32>
    %228 = vector.shape_cast %227 : vector<8xf32> to vector<8x1xf32>
    %cst_92 = arith.constant 3.200000e+01 : f32
    %229 = vector.broadcast %cst_92 : f32 to vector<8x1xf32>
    %230 = arith.divf %228, %229 : vector<8x1xf32>
    %cst_93 = arith.constant 9.99999974E-6 : f32
    %231 = vector.broadcast %cst_93 : f32 to vector<8x1xf32>
    %232 = arith.addf %230, %231 : vector<8x1xf32>
    %233 = math.rsqrt %232 : vector<8x1xf32>
    %234 = vector.broadcast %223 : vector<8x1xf32> to vector<8x32xf32>
    %235 = arith.subf %219, %234 : vector<8x32xf32>
    %236 = vector.broadcast %233 : vector<8x1xf32> to vector<8x32xf32>
    %237 = arith.mulf %235, %236 : vector<8x32xf32>
    %c0_94 = arith.constant 0 : index
    %c0_95 = arith.constant 0 : index
    %238 = vector.load %arg19[%c0_94, %c0_95] : memref<1x32xf32, #tpu.memory_space<vmem>>, vector<1x32xf32>
    %239 = vector.broadcast %238 : vector<1x32xf32> to vector<8x32xf32>
    %240 = arith.mulf %237, %239 : vector<8x32xf32>
    %c0_96 = arith.constant 0 : index
    %c0_97 = arith.constant 0 : index
    %241 = vector.load %arg20[%c0_96, %c0_97] : memref<1x32xf32, #tpu.memory_space<vmem>>, vector<1x32xf32>
    %242 = vector.broadcast %241 : vector<1x32xf32> to vector<8x32xf32>
    %243 = arith.addf %240, %242 : vector<8x32xf32>
    %c0_98 = arith.constant 0 : index
    %c0_99 = arith.constant 0 : index
    %244 = vector.load %arg13[%c0_98, %c0_99] : memref<32x64xf32, #tpu.memory_space<vmem>>, vector<32x64xf32>
    %cst_100 = arith.constant dense<0.000000e+00> : vector<8x64xf32>
    %245 = tpu.matmul %243, %244, %cst_100 {dimension_numbers = #tpu.dot_dimension_numbers<[1], [0], [0], [1], [0, 0, 1, 1], [], []>} : vector<8x32xf32>, vector<32x64xf32>, vector<8x64xf32> -> vector<8x64xf32>
    %c0_101 = arith.constant 0 : index
    %c0_102 = arith.constant 0 : index
    %246 = vector.load %arg14[%c0_101, %c0_102] : memref<1x64xf32, #tpu.memory_space<vmem>>, vector<1x64xf32>
    %247 = vector.broadcast %246 : vector<1x64xf32> to vector<8x64xf32>
    %248 = arith.addf %245, %247 : vector<8x64xf32>
    %cst_103 = arith.constant 0.000000e+00 : f32
    %249 = vector.broadcast %cst_103 : f32 to vector<8x64xf32>
    %250 = arith.maximumf %248, %249 : vector<8x64xf32>
    %c0_104 = arith.constant 0 : index
    %c0_105 = arith.constant 0 : index
    %251 = vector.load %arg15[%c0_104, %c0_105] : memref<64x32xf32, #tpu.memory_space<vmem>>, vector<64x32xf32>
    %cst_106 = arith.constant dense<0.000000e+00> : vector<8x32xf32>
    %252 = tpu.matmul %250, %251, %cst_106 {dimension_numbers = #tpu.dot_dimension_numbers<[1], [0], [0], [1], [0, 0, 1, 1], [], []>} : vector<8x64xf32>, vector<64x32xf32>, vector<8x32xf32> -> vector<8x32xf32>
    %c0_107 = arith.constant 0 : index
    %c0_108 = arith.constant 0 : index
    %253 = vector.load %arg16[%c0_107, %c0_108] : memref<1x32xf32, #tpu.memory_space<vmem>>, vector<1x32xf32>
    %254 = vector.broadcast %253 : vector<1x32xf32> to vector<8x32xf32>
    %255 = arith.addf %252, %254 : vector<8x32xf32>
    %256 = arith.addf %243, %255 : vector<8x32xf32>
    %cst_109 = arith.constant dense<0.000000e+00> : vector<8xf32>
    %257 = vector.multi_reduction <add>, %256, %cst_109 [1] : vector<8x32xf32> to vector<8xf32>
    %258 = vector.shape_cast %257 : vector<8xf32> to vector<8x1xf32>
    %cst_110 = arith.constant 3.200000e+01 : f32
    %259 = vector.broadcast %cst_110 : f32 to vector<8x1xf32>
    %260 = arith.divf %258, %259 : vector<8x1xf32>
    %261 = vector.broadcast %260 : vector<8x1xf32> to vector<8x32xf32>
    %262 = arith.subf %256, %261 : vector<8x32xf32>
    %263 = arith.mulf %262, %262 : vector<8x32xf32>
    %cst_111 = arith.constant dense<0.000000e+00> : vector<8xf32>
    %264 = vector.multi_reduction <add>, %263, %cst_111 [1] : vector<8x32xf32> to vector<8xf32>
    %265 = vector.shape_cast %264 : vector<8xf32> to vector<8x1xf32>
    %cst_112 = arith.constant 3.200000e+01 : f32
    %266 = vector.broadcast %cst_112 : f32 to vector<8x1xf32>
    %267 = arith.divf %265, %266 : vector<8x1xf32>
    %cst_113 = arith.constant 9.99999974E-6 : f32
    %268 = vector.broadcast %cst_113 : f32 to vector<8x1xf32>
    %269 = arith.addf %267, %268 : vector<8x1xf32>
    %270 = math.rsqrt %269 : vector<8x1xf32>
    %271 = vector.broadcast %260 : vector<8x1xf32> to vector<8x32xf32>
    %272 = arith.subf %256, %271 : vector<8x32xf32>
    %273 = vector.broadcast %270 : vector<8x1xf32> to vector<8x32xf32>
    %274 = arith.mulf %272, %273 : vector<8x32xf32>
    %c0_114 = arith.constant 0 : index
    %c0_115 = arith.constant 0 : index
    %275 = vector.load %arg21[%c0_114, %c0_115] : memref<1x32xf32, #tpu.memory_space<vmem>>, vector<1x32xf32>
    %276 = vector.broadcast %275 : vector<1x32xf32> to vector<8x32xf32>
    %277 = arith.mulf %274, %276 : vector<8x32xf32>
    %c0_116 = arith.constant 0 : index
    %c0_117 = arith.constant 0 : index
    %278 = vector.load %arg22[%c0_116, %c0_117] : memref<1x32xf32, #tpu.memory_space<vmem>>, vector<1x32xf32>
    %279 = vector.broadcast %278 : vector<1x32xf32> to vector<8x32xf32>
    %280 = arith.addf %277, %279 : vector<8x32xf32>
    %c0_118 = arith.constant 0 : index
    %c0_119 = arith.constant 0 : index
    %c0_120 = arith.constant 0 : index
    %281 = vector.load %arg23[%c0_118, %c0_119, %c0_120] : memref<1x8x32xf32, #tpu.memory_space<vmem>>, vector<1x8x32xf32>
    %282 = vector.shape_cast %281 : vector<1x8x32xf32> to vector<8x32xf32>
    %283 = vector.shape_cast %280 : vector<8x32xf32> to vector<1x8x32xf32>
    tpu.vector_store %arg23[%c0_118, %c0_119, %c0_120], %283 {strides = array<i32>} : memref<1x8x32xf32, #tpu.memory_space<vmem>>, vector<1x8x32xf32>,
    return
  }
  func.func @transform_0(%arg0: i32) -> (i32, i32, i32) {
    %c0_i32 = arith.constant 0 : i32
    %c0_i32_0 = arith.constant 0 : i32
    %c0_i32_1 = arith.constant 0 : i32
    return %arg0, %c0_i32, %c0_i32_0 : i32, i32, i32
  }
  func.func @transform_1(%arg0: i32) -> (i32, i32, i32) {
    %c0_i32 = arith.constant 0 : i32
    %c0_i32_0 = arith.constant 0 : i32
    %c0_i32_1 = arith.constant 0 : i32
    return %arg0, %c0_i32, %c0_i32_0 : i32, i32, i32
  }
  func.func @transform_2(%arg0: i32) -> (i32, i32) {
    %c0_i32 = arith.constant 0 : i32
    %c0_i32_0 = arith.constant 0 : i32
    %c0_i32_1 = arith.constant 0 : i32
    return %c0_i32, %c0_i32_0 : i32, i32
  }
  func.func @transform_3(%arg0: i32) -> (i32, i32) {
    %c0_i32 = arith.constant 0 : i32
    %c0_i32_0 = arith.constant 0 : i32
    %c0_i32_1 = arith.constant 0 : i32
    return %c0_i32, %c0_i32_0 : i32, i32
  }
  func.func @transform_4(%arg0: i32) -> (i32, i32) {
    %c0_i32 = arith.constant 0 : i32
    %c0_i32_0 = arith.constant 0 : i32
    %c0_i32_1 = arith.constant 0 : i32
    return %c0_i32, %c0_i32_0 : i32, i32
  }
  func.func @transform_5(%arg0: i32) -> (i32, i32) {
    %c0_i32 = arith.constant 0 : i32
    %c0_i32_0 = arith.constant 0 : i32
    %c0_i32_1 = arith.constant 0 : i32
    return %c0_i32, %c0_i32_0 : i32, i32
  }
  func.func @transform_6(%arg0: i32) -> (i32, i32) {
    %c0_i32 = arith.constant 0 : i32
    %c0_i32_0 = arith.constant 0 : i32
    %c0_i32_1 = arith.constant 0 : i32
    return %c0_i32, %c0_i32_0 : i32, i32
  }
  func.func @transform_7(%arg0: i32) -> (i32, i32) {
    %c0_i32 = arith.constant 0 : i32
    %c0_i32_0 = arith.constant 0 : i32
    %c0_i32_1 = arith.constant 0 : i32
    return %c0_i32, %c0_i32_0 : i32, i32
  }
  func.func @transform_8(%arg0: i32) -> (i32, i32) {
    %c0_i32 = arith.constant 0 : i32
    %c0_i32_0 = arith.constant 0 : i32
    %c0_i32_1 = arith.constant 0 : i32
    return %c0_i32, %c0_i32_0 : i32, i32
  }
  func.func @transform_9(%arg0: i32) -> (i32, i32) {
    %c0_i32 = arith.constant 0 : i32
    %c0_i32_0 = arith.constant 0 : i32
    %c0_i32_1 = arith.constant 0 : i32
    return %c0_i32, %c0_i32_0 : i32, i32
  }
  func.func @transform_10(%arg0: i32) -> (i32, i32) {
    %c0_i32 = arith.constant 0 : i32
    %c0_i32_0 = arith.constant 0 : i32
    %c0_i32_1 = arith.constant 0 : i32
    return %c0_i32, %c0_i32_0 : i32, i32
  }
  func.func @transform_11(%arg0: i32) -> (i32, i32) {
    %c0_i32 = arith.constant 0 : i32
    %c0_i32_0 = arith.constant 0 : i32
    %c0_i32_1 = arith.constant 0 : i32
    return %c0_i32, %c0_i32_0 : i32, i32
  }
  func.func @transform_12(%arg0: i32) -> (i32, i32) {
    %c0_i32 = arith.constant 0 : i32
    %c0_i32_0 = arith.constant 0 : i32
    %c0_i32_1 = arith.constant 0 : i32
    return %c0_i32, %c0_i32_0 : i32, i32
  }
  func.func @transform_13(%arg0: i32) -> (i32, i32) {
    %c0_i32 = arith.constant 0 : i32
    %c0_i32_0 = arith.constant 0 : i32
    %c0_i32_1 = arith.constant 0 : i32
    return %c0_i32, %c0_i32_0 : i32, i32
  }
  func.func @transform_14(%arg0: i32) -> (i32, i32) {
    %c0_i32 = arith.constant 0 : i32
    %c0_i32_0 = arith.constant 0 : i32
    %c0_i32_1 = arith.constant 0 : i32
    return %c0_i32, %c0_i32_0 : i32, i32
  }
  func.func @transform_15(%arg0: i32) -> (i32, i32) {
    %c0_i32 = arith.constant 0 : i32
    %c0_i32_0 = arith.constant 0 : i32
    %c0_i32_1 = arith.constant 0 : i32
    return %c0_i32, %c0_i32_0 : i32, i32
  }
  func.func @transform_16(%arg0: i32) -> (i32, i32) {
    %c0_i32 = arith.constant 0 : i32
    %c0_i32_0 = arith.constant 0 : i32
    %c0_i32_1 = arith.constant 0 : i32
    return %c0_i32, %c0_i32_0 : i32, i32
  }
  func.func @transform_17(%arg0: i32) -> (i32, i32) {
    %c0_i32 = arith.constant 0 : i32
    %c0_i32_0 = arith.constant 0 : i32
    %c0_i32_1 = arith.constant 0 : i32
    return %c0_i32, %c0_i32_0 : i32, i32
  }
  func.func @transform_18(%arg0: i32) -> (i32, i32) {
    %c0_i32 = arith.constant 0 : i32
    %c0_i32_0 = arith.constant 0 : i32
    %c0_i32_1 = arith.constant 0 : i32
    return %c0_i32, %c0_i32_0 : i32, i32
  }
  func.func @transform_19(%arg0: i32) -> (i32, i32) {
    %c0_i32 = arith.constant 0 : i32
    %c0_i32_0 = arith.constant 0 : i32
    %c0_i32_1 = arith.constant 0 : i32
    return %c0_i32, %c0_i32_0 : i32, i32
  }
  func.func @transform_20(%arg0: i32) -> (i32, i32) {
    %c0_i32 = arith.constant 0 : i32
    %c0_i32_0 = arith.constant 0 : i32
    %c0_i32_1 = arith.constant 0 : i32
    return %c0_i32, %c0_i32_0 : i32, i32
  }
  func.func @transform_21(%arg0: i32) -> (i32, i32) {
    %c0_i32 = arith.constant 0 : i32
    %c0_i32_0 = arith.constant 0 : i32
    %c0_i32_1 = arith.constant 0 : i32
    return %c0_i32, %c0_i32_0 : i32, i32
  }
  func.func @transform_22(%arg0: i32) -> (i32, i32, i32) {
    %c0_i32 = arith.constant 0 : i32
    %c0_i32_0 = arith.constant 0 : i32
    %c0_i32_1 = arith.constant 0 : i32
    return %arg0, %c0_i32, %c0_i32_0 : i32, i32, i32
  }
}

</mosaic_0001>

<bundles_post_ra>
// kernel: decoder_forward.5
= control target key start
LH: loop header
LB: loop body
LE: loop exit
PB: predicated region body
PF: predicated region fallthrough
CT: control target
= control target key end

     0   :  { %vm30_vm0 = vcmask 261120   ;;  %vm19_vm1 = vcmask 523264   ;;  %v205_v6 = vmov 0.0   ;;  %s270_s0 = inlined_call_operand.vmem [shape: f32[16,32], index: 0, kind: input, shape index: {}]   ;;  %s271_s1 = inlined_call_operand.vmem [shape: f32[32,64], index: 1, kind: input, shape index: {}]   ;;  %s272_s2 = inlined_call_operand.vmem [shape: f32[1,64], index: 2, kind: input, shape index: {}]   ;;  %s273_s3 = inlined_call_operand.hbm [shape: f32[16,64], index: 3, kind: output, shape index: {}]  }
   0x1   :  { %v26_v0 = vld [vmem:[%s271_s1] sm:$0xff]  ;;  %v27_v1 = vld [vmem:[%s271_s1 + $0x8] sm:$0xff]  ;;  %v28_v2 = vld [vmem:[%s271_s1 + $0x10] sm:$0xff]  ;;  %21 = vst.msk [vmem:[#allocation2 + $0x8] sm:$0xff] %vm19_vm1, %v205_v6 }
   0x2   :  { %v169_v3 = vpack.c.bf16 %v27_v1, %v26_v0  ;;  %v29_v4 = vld [vmem:[%s271_s1 + $0x18] sm:$0xff]  ;;  %v24_v5 = vld [vmem:[%s270_s0] sm:$0xff]  ;;  %20 = vst.msk [vmem:[#allocation2] sm:$0xff] %vm19_vm1, %v205_v6 }
   0x3   :  { %v173_v7 = vpack.c.bf16 %v29_v4, %v28_v2  ;;  %166 = vmatprep.mubr.msk.f32.mxu0 %vm30_vm0, %v24_v5 }
   0x4   :  { %8 = vsyncpa [#allocation4], 0  ;;  %170 = vmatprep.subr.bf16.mxu0 %v169_v3  ;;  %v25_v8 = vld [vmem:[%s270_s0 + $0x8] sm:$0xff]  ;;  %v151_v15 = vld [vmem:[%s272_s2] ss:$0 sm:$0xff]  ;;  %s206_s25 = smov [#allocation3]  }
   0x5   :  { %172 = vmatpush3.bf16.msra.mxu0 %v169_v3  ;;  %s138_s26 = sshll.u32 %s206_s25, 4  ;;  %s139_s26 = int_to_ptr.vmem [resolvable:$true] %s138_s26 }
   0x6   :  { %174 = vmatprep.subr.bf16.mxu0 %v173_v7  ;;  %s181_s0 = scalar_lea.vmem %s139_s26, 256  ;;  %p186_p1 = scmp.lt.s32.totalorder %s139_s26, %s139_s26 }
   0x7   :  { %p182_p0 = scmp.ne.s32.totalorder %s139_s26, %s181_s0  ;;  %p187_p2 = scmp.lt.s32.totalorder %s181_s0, %s181_s0 }
   0x8   :  { %v23_v9 = vld [vmem:[#allocation2 + $0x8] sm:$0xff] }
   0x9   :  { %176 = vmatpush3.bf16.msra.mxu0 %v173_v7  ;;  %v22_v10 = vld [vmem:[#allocation2] sm:$0xff]  ;;  %p188_p3 = por %p187_p2, %p186_p1 }
   0xb   :  { %p189_p4 = pnand %p188_p3, %p182_p0 }
   0xc   :  { %167 = vmatmul.mubr.msk.f32.vlgmr.msra.gmra.mrb[0].mxu0 %vm30_vm0, %v25_v8 }
  0xdf   :  { %v168_v11 = vpop.f32.mrb[0].mxu0 }
  0xe0   :  { %v113_v12 = vadd.f32 %v168_v11, %v23_v9  ;;  %v103_v13 = vpop.f32.mrb[1].mxu0 }
  0xe1   :  { %v112_v14 = vadd.f32 %v103_v13, %v22_v10 }
  0xe2   :  { %116 = vst.msk [vmem:[#allocation2 + $0x8] sm:$0xff] %vm19_vm1, %v113_v12 }
  0xe3   :  { %115 = vst.msk [vmem:[#allocation2] sm:$0xff] %vm19_vm1, %v112_v14 }
  0xe9   :  { %v121_v16 = vld [vmem:[#allocation2 + $0x8] sm:$0xff] }
  0xea   :  { %v120_v17 = vld [vmem:[#allocation2] sm:$0xff]  ;;  %v130_v18 = vadd.f32 %v151_v15, %v121_v16 }
  0xeb   :  { %v129_v19 = vadd.f32 %v151_v15, %v120_v17 }
  0xec   :  { %132 = vst.msk [vmem:[#allocation3 + $0x8] sm:$0xff] %vm19_vm1, %v130_v18 }
  0xed   :  { %131 = vst.msk [vmem:[#allocation3] sm:$0xff] %vm19_vm1, %v129_v19 }
  0xee   :  { %192 = shalt.err (!%p189_p4)
}
  0xef   :  { %s193_s28 = scalar_lea.hbm %s273_s3, 256 }
  0xf0   :  { %p194_p5 = scmp.ne.s32.totalorder %s273_s3, %s193_s28  ;;  %p197_p6 = scmp.lt.u32.totalorder %s193_s28, %s273_s3 }
  0xf2   :  { %p199_p7 = pnand %p197_p6, %p194_p5 }
  0xf4   :  { %202 = shalt.err (!%p199_p7)
}
  0xf5   :  { %s207_s6 = smov 128   ;;  %s208_s7 = smov 8  }
  0xf6   :  { %144 = dma.vmem_to_hbm [thread:$0]  %s139_s26, 256, %s273_s3, [#allocation4], %s207_s6, %s207_s6, %s208_s7  }
  0xf7   :  { %203 = dma.done.wait [#allocation4], 256  }
  0xf8   :  { %204 = vsyncadd [#allocation4], 4294967040 }
  0xf9   :  { %148 = vsyncpa [#allocation4], 1 }

// kernel: decoder_forward.3
= control target key start
LH: loop header
LB: loop body
LE: loop exit
PB: predicated region body
PF: predicated region fallthrough
CT: control target
= control target key end

     0   :  { %s4150_s0 = inlined_call_operand.vmem [shape: f32[2,8,32], index: 0, kind: input, shape index: {}]   ;;  %s4151_s1 = inlined_call_operand.vmem [shape: f32[2,8,32], index: 1, kind: input, shape index: {}]   ;;  %s4152_s2 = inlined_call_operand.vmem [shape: f32[32,96], index: 2, kind: input, shape index: {}]   ;;  %s4153_s3 = inlined_call_operand.vmem [shape: f32[1,96], index: 3, kind: input, shape index: {}]   ;;  %s4154_s4 = inlined_call_operand.vmem [shape: f32[32,32], index: 4, kind: input, shape index: {}]   ;;  %s4155_s5 = inlined_call_operand.vmem [shape: f32[1,32], index: 5, kind: input, shape index: {}]   ;;  %s4156_s6 = inlined_call_operand.vmem [shape: f32[32,32], index: 6, kind: input, shape index: {}]   ;;  %s4157_s7 = inlined_call_operand.vmem [shape: f32[1,32], index: 7, kind: input, shape index: {}]   ;;  %s4158_s8 = inlined_call_operand.vmem [shape: f32[32,64], index: 8, kind: input, shape index: {}]   ;;  %s4159_s9 = inlined_call_operand.vmem [shape: f32[1,64], index: 9, kind: input, shape index: {}]   ;;  %s4160_s10 = inlined_call_operand.vmem [shape: f32[32,32], index: 10, kind: input, shape index: {}]   ;;  %s4161_s11 = inlined_call_operand.vmem [shape: f32[1,32], index: 11, kind: input, shape index: {}]   ;;  %s4162_s12 = inlined_call_operand.vmem [shape: f32[32,64], index: 12, kind: input, shape index: {}]   ;;  %s4163_s13 = inlined_call_operand.vmem [shape: f32[1,64], index: 13, kind: input, shape index: {}]   ;;  %s4164_s14 = inlined_call_operand.vmem [shape: f32[64,32], index: 14, kind: input, shape index: {}]   ;;  %s4165_s15 = inlined_call_operand.vmem [shape: f32[1,32], index: 15, kind: input, shape index: {}]   ;;  %s4166_s16 = inlined_call_operand.vmem [shape: f32[1,32], index: 16, kind: input, shape index: {}]   ;;  %s4167_s17 = inlined_call_operand.vmem [shape: f32[1,32], index: 17, kind: input, shape index: {}]   ;;  %s4168_s18 = inlined_call_operand.vmem [shape: f32[1,32], index: 18, kind: input, shape index: {}]   ;;  %s4169_s19 = inlined_call_operand.vmem [shape: f32[1,32], index: 19, kind: input, shape index: {}]   ;;  %s4170_s20 = inlined_call_operand.vmem [shape: f32[1,32], index: 20, kind: input, shape index: {}]   ;;  %s4171_s21 = inlined_call_operand.vmem [shape: f32[1,32], index: 21, kind: input, shape index: {}]   ;;  %s4172_s22 = inlined_call_operand.vmem [shape: f32[2,8,32], index: 22, kind: output, shape index: {}]  }
   0x1   :  { %4188 = sst [smem:[#allocation2_spill]] %s4150_s0 }
   0x2   :  { %4189 = sst [smem:[#allocation3_spill]] %s4151_s1 }
   0x3   :  { %4190 = sst [smem:[#allocation4_spill]] %s4152_s2 }
   0x4   :  { %4191 = sst [smem:[#allocation5_spill]] %s4153_s3  ;;  %s3773_s3 = smov 0  }
   0x5   :  { %4192 = sst [smem:[#allocation6_spill]] %s4154_s4 }
   0x6   :  { %4193 = sst [smem:[#allocation7_spill]] %s4155_s5 }
   0x7   :  { %4194 = sst [smem:[#allocation8_spill]] %s4156_s6 }
   0x8 LB: > { %s3218_s28 = sadd.s32 4294967295, %s3641_s3   ;;  %p3222_p0 = scmp.ge.s32.totalorder %s3641_s3, 1  ;;  %s3641_s3 = sphi %s3773_s3, %s32_s3  }
   0x9   : > { %p620_p1 = scmp.lt.s32.totalorder %s3641_s3, 3 }
   0xb   : > { %p621_p2 = pnand %p3222_p0, %p620_p1 }
   0xc   : > { %s4195_s4 = sld [smem:[#allocation4_spill]] (!%p621_p2)  ;;  %v3643_v3 = vmov (!%p621_p2), 0.0|0.0   ;;  %vm3644_vm0 = vmmov (!%p621_p2), 0   ;;  %v3645_v6 = vmov (!%p621_p2), 0.0   ;;  %p684_p3 = scmp.lt.s32.totalorder (!%p621_p2), %s3218_s28, 1  ;;  %vm715_vm1 = vcmask (!%p621_p2), 261120  }
   0xd   : > { %624 = sbr.rel (%p621_p2) target bundleno = 6527 (0x197f), region = 108  ;;  %3538 = vmatprep.subr.bf16.mxu0 (!%p621_p2), %v3643_v3  ;;  %3363 = vmatprep.mubr.msk.f32.mxu0 (!%p621_p2), %vm3644_vm0, %v3645_v6  ;;  %s4196_s27 = sld [smem:[#allocation2_spill]] (!%p621_p2)  ;;  %vm792_vm2 = vcmask (!%p621_p2), 64512   ;;  %v698_v16 = vlaneseq (!%p621_p2)  ;;  %v3649_v19 = vmov (!%p621_p2), -1e+09   ;;  %vm3048_vm4 = vcmask (!%p621_p2), 523264  }
   0xe   : > { %3371 = vmatprep.subr.mxu1 (!%p621_p2), %v3645_v6  ;;  %3373 = vmatprep.mubr.msk.f32.mxu1 (!%p621_p2), %vm3644_vm0, %v3645_v6  ;;  %s4197_s0 = sld [smem:[#allocation5_spill]] (!%p621_p2)  ;;  %s4184_s23 = smov (!%p621_p2), 120  }
   0xf   : > { %s4180_s1 = smov (!%p621_p2), 96   ;;  %s4183_s5 = smov (!%p621_p2), 88   ;;  %v699_v17 = vshrl.u32 (!%p621_p2), %v698_v16, 7  ;;  %v701_v18 = vand.u32 (!%p621_p2), 127, %v698_v16 }
  0x10   : > { %s3650_s24 = smov (!%p621_p2), 56   ;;  %s3651_s6 = smov (!%p621_p2), 64  }
  0x11   : > { %vm702_vm3 = vcmp.le.s32.totalorder (!%p621_p2), %v701_v18, %v699_v17  ;;  %s4177_s26 = smov (!%p621_p2), 80   ;;  %s4181_s2 = smov (!%p621_p2), 112  }
  0x12   : > { %v704_v0 = vld [vmem:[%s4195_s4] sm:$0xff] (!%p621_p2)  ;;  %v705_v1 = vld [vmem:[%s4195_s4 + $0x8] sm:$0xff] (!%p621_p2)  ;;  %v706_v2 = vld [vmem:[%s4195_s4 + $0x10] sm:$0xff] (!%p621_p2)  ;;  %v3835_v20 = vsel (!%p621_p2), %vm702_vm3, 0.0, %v3649_v19  ;;  %s4198_s30 = sld [smem:[#allocation6_spill]] (!%p621_p2) }
  0x13   : > { %v3539_v4 = vpack.c.bf16 (!%p621_p2), %v705_v1, %v704_v0  ;;  %v707_v5 = vld [vmem:[%s4195_s4 + $0x18] sm:$0xff] (!%p621_p2)  ;;  %s4201_s4 = sld [smem:[#allocation3_spill]] (!%p621_p2) }
  0x14   : > { %v3542_v7 = vpack.c.bf16 %v707_v5, %v706_v2  ;;  %s4210_s28 = smov (!%p684_p3, %s3218_s28), 1  ;;  %v3226_v9 = vld [vmem:[%s4197_s0] ss:$0 sm:$0xff]  ;;  %s3657_s0 = smov 40  }
  0x15   : > { %3540 = vmatpush3.bf16.msra.mxu0 %v3539_v4  ;;  %s3800_s25 = sshll.u32 %s4210_s28, 3  ;;  %s4202_s28 = smov 120  }
  0x16   : > { %3541 = vmatprep.subr.bf16.mxu0 %v3643_v3  ;;  %s687_s29 = scalar_lea.vmem %s4196_s27, %s3800_s25  ;;  %s3656_s27 = smov 48  }
  0x17   : > { %v3806_v8 = vld [vmem:[%s687_s29] sm:$0xff]  ;;  %s4207_s29 = smov 80  }
  0x18   : > { %v1120_v39 = vld [vmem:[%s4198_s30 + $0x8] sm:$0xff]  ;;  %v954_v48 = vld [vmem:[%s4198_s30] sm:$0xff] }
  0x19   : > { %3543 = vmatpush3.bf16.msra.mxu0 %v3542_v7 }
  0x1a   : > { %3366 = vmatprep.subr.mxu0 %v3645_v6 }
  0x1c   : > { %3364 = vmatmul.mubr.msk.f32.vlgmr.msra.gmra.mrb[0].mxu0 %vm715_vm1, %v3806_v8 }
  0x1d   : > { %3368 = vmatprep.mubr.msk.f32.mxu0 %vm3644_vm0, %v3645_v6 }
  0xef   : > { %v785_v10 = vpop.f32.mrb[0].mxu0 }
  0xf0   : > { %v3816_v11 = vadd.f32 %v3226_v9, %v785_v10  ;;  %v3365_v12 = vpop.f32.mrb[1].mxu0 }
  0xf2   : > { %955 = vrot.lane.b32.xlu1 %v3816_v11, %s4184_s23  ;;  %790 = vrot.lane.b32.xlu0 %v3816_v11, %s4180_s1  ;;  %s4204_s1 = smov 112  }
  0xf6   : > { %957 = vrot.lane.b32.xlu0 %v3816_v11, %s4183_s5 }
 0x164   : > { %v791_v13 = vpop.permute.xlu0 %790  ;;  %v956_v15 = vpop.permute.xlu1 %955 }
 0x165   : > { %3367 = vmatpush3.xpose.msk.msra.mxu0 %vm792_vm2, %v791_v13 }
 0x166   : > { %3376 = vmatprep.subr.mxu0 %v3645_v6 }
 0x168   : > { %3369 = vmatmul.mubr.msk.f32.vlgmr.msra.gmra.mrb[2].mxu0 %vm792_vm2, %v3816_v11  ;;  %v958_v14 = vpop.permute.xlu0 %957 }
 0x169   : > { %3377 = vmatpush3.xpose.msk.msra.mxu0 %vm792_vm2, %v958_v14  ;;  %3378 = vmatprep.mubr.msk.f32.mxu0 %vm3644_vm0, %v3645_v6 }
 0x16a   : > { %3386 = vmatprep.subr.mxu0 %v3645_v6 }
 0x16c   : > { %3379 = vmatmul.mubr.msk.f32.vlgmr.msra.gmra.mrb[4].mxu0 %vm792_vm2, %v956_v15  ;;  %v1432_v15 = vld [vmem:[%s4198_s30 + $0x10] sm:$0xff] }
 0x16d   : > { %3388 = vmatprep.mubr.msk.f32.mxu0 %vm3644_vm0, %v3645_v6  ;;  %3387 = vmatpush3.msra.mxu0 %v1120_v39 }
 0x16e   : > { %3396 = vmatprep.subr.mxu0 %v3645_v6 }
 0x23b   : > { %v863_v21 = vpop.f32.mrb[2].mxu0 }
 0x23c   : > { %v864_v22 = vadd.f32 %v863_v21, %v3835_v20  ;;  %v3370_v23 = vpop.f32.mrb[3].mxu0 }
 0x23e   : > { %v867_v24 = vsel %vm792_vm2, %v864_v22, -inf }
 0x23f   : > { %868 = vmax.xlane.f32.xlu1 %v867_v24  ;;  %v1029_v25 = vpop.f32.mrb[4].mxu0 }
 0x240   : > { %v1030_v26 = vadd.f32 %v1029_v25, %v3835_v20  ;;  %v3380_v27 = vpop.f32.mrb[5].mxu0 }
 0x242   : > { %v1033_v28 = vsel %vm792_vm2, %v1030_v26, -inf }
 0x243   : > { %1034 = vmax.xlane.f32.xlu0 %v1033_v28 }
 0x2cc   : > { %v869_v29 = vpop.xlane.xlu1 %868 }
 0x2cd   : > { %v870_v30 = vsub.f32 %v864_v22, %v869_v29 }
 0x2cf   : > { %v871_v31 = vmul.f32 1.442695, %v870_v30 }
 0x2d0   : > { %v1035_v32 = vpop.xlane.xlu0 %1034 }
 0x2d1   : > { %3597 = vpow2.f32 %v871_v31  ;;  %v1036_v33 = vsub.f32 %v1030_v26, %v1035_v32 }
 0x2d3   : > { %v1037_v34 = vmul.f32 1.442695, %v1036_v33 }
 0x2d5   : > { %3599 = vpow2.f32 %v1037_v34 }
 0x2db   : > { %v3598_v35 = vpop.eup %3597 }
 0x2dc   : > { %v873_v36 = vsel %vm792_vm2, %v3598_v35, 0.0 }
 0x2dd   : > { %874 = vadd.xlane.f32.xlu0 %v873_v36 }
 0x2df   : > { %v3600_v37 = vpop.eup %3599 }
 0x2e0   : > { %v1039_v38 = vsel %vm792_vm2, %v3600_v37, 0.0 }
 0x2e1   : > { %1040 = vadd.xlane.f32.xlu1 %v1039_v38 }
 0x2f2   : > { %1044 = vrot.lane.b32.xlu1 %v3816_v11, %s3650_s24  ;;  %s4176_s24 = smov 72  }
 0x2f3   : > { %878 = vrot.lane.b32.xlu0 %v3816_v11, %s3651_s6  ;;  %s4178_s6 = smov 104  }
 0x2f6   : > { %1269 = vrot.lane.b32.xlu1 %v3816_v11, %s4177_s26  ;;  %s691_s26 = scalar_lea.vmem %s4201_s4, %s3800_s25 }
 0x2f7   : > { %1267 = vrot.lane.b32.xlu0 %v3816_v11, %s4181_s2  ;;  %s4205_s2 = smov 96  }
 0x36a   : > { %v875_v40 = vpop.xlane.xlu0 %874 }
 0x36b   : > { %3601 = vrcp.f32 %v875_v40 }
 0x36e   : > { %v1041_v41 = vpop.xlane.xlu1 %1040  ;;  %v879_v42 = vpop.permute.xlu0 %878 }
 0x36f   : > { %3603 = vrcp.f32 %v1041_v41  ;;  %3372 = vmatpush3.msra.mxu1 %v879_v42 }
 0x370   : > { %3381 = vmatprep.subr.mxu1 %v3645_v6 }
 0x372   : > { %v1045_v45 = vpop.permute.xlu1 %1044  ;;  %v1268_v54 = vpop.permute.xlu0 %1267 }
 0x375   : > { %v3602_v43 = vpop.eup %3601 }
 0x376   : > { %v877_v44 = vmul.f32 %v3602_v43, %v3598_v35  ;;  %v1270_v52 = vpop.permute.xlu1 %1269 }
 0x378   : > { %3374 = vmatmul.mubr.msk.f32.vlgmr.msra.gmra.mrb[0].mxu1 %vm792_vm2, %v877_v44 }
 0x379   : > { %v3604_v46 = vpop.eup %3603  ;;  %3382 = vmatpush3.msra.mxu1 %v1045_v45  ;;  %3383 = vmatprep.mubr.msk.f32.mxu1 %vm3644_vm0, %v3645_v6 }
 0x37a   : > { %v1043_v47 = vmul.f32 %v3604_v46, %v3600_v37  ;;  %3391 = vmatprep.subr.mxu1 %v3645_v6 }
 0x37c   : > { %3384 = vmatmul.mubr.msk.f32.vlgmr.msra.gmra.mrb[2].mxu1 %vm792_vm2, %v1043_v47 }
 0x37d   : > { %3393 = vmatprep.mubr.msk.f32.mxu1 %vm3644_vm0, %v3645_v6  ;;  %3392 = vmatpush3.msra.mxu1 %v954_v48  ;;  %v1870_v48 = vld [vmem:[%s4158_s8] sm:$0xff] }
 0x37e   : > { %3401 = vmatprep.subr.mxu1 %v3645_v6 }
 0x44b   : > { %v950_v49 = vpop.f32.mrb[0].mxu1 }
 0x44c   : > { %v3375_v50 = vpop.f32.mrb[1].mxu1  ;;  %3394 = vmatmul.mubr.msk.f32.vlgmr.msra.gmra.mrb[4].mxu1 %vm792_vm2, %v950_v49  ;;  %v1871_v49 = vld [vmem:[%s4158_s8 + $0x8] sm:$0xff] }
 0x44d   : > { %3403 = vmatprep.mubr.msk.f32.mxu1 %vm3644_vm0, %v3645_v6 }
 0x44f   : > { %v1116_v51 = vpop.f32.mrb[2].mxu1 }
 0x450   : > { %v3385_v53 = vpop.f32.mrb[3].mxu1  ;;  %3389 = vmatmul.mubr.msk.f32.vlgmr.msra.gmra.mrb[6].mxu0 %vm792_vm2, %v1116_v51 }
 0x451   : > { %3397 = vmatpush3.xpose.msk.msra.mxu0 %vm792_vm2, %v1270_v52  ;;  %3398 = vmatprep.mubr.msk.f32.mxu0 %vm3644_vm0, %v3645_v6  ;;  %v1872_v52 = vld [vmem:[%s4158_s8 + $0x10] sm:$0xff] }
 0x452   : > { %3406 = vmatprep.subr.mxu0 %v3645_v6 }
 0x454   : > { %3399 = vmatmul.mubr.msk.f32.vlgmr.msra.gmra.mrb[8].mxu0 %vm792_vm2, %v1268_v54  ;;  %v1873_v54 = vld [vmem:[%s4158_s8 + $0x18] sm:$0xff] }
 0x455   : > { %3408 = vmatprep.mubr.msk.f32.mxu0 %vm3644_vm0, %v3645_v6  ;;  %3407 = vmatpush3.msra.mxu0 %v1432_v15 }
 0x456   : > { %3416 = vmatprep.subr.mxu0 %v3645_v6 }
 0x51f   : > { %v1263_v55 = vpop.f32.mrb[4].mxu1 }
 0x520   : > { %v3395_v56 = vpop.f32.mrb[5].mxu1 }
 0x523   : > { %v1190_v57 = vpop.f32.mrb[6].mxu0 }
 0x524   : > { %v3876_v58 = vadd.f32 %v1263_v55, %v1190_v57  ;;  %v3390_v59 = vpop.f32.mrb[7].mxu0  ;;  %v3554_v55 = vpack.c.bf16 %v1873_v54, %v1872_v52 }
 0x527   : > { %v1341_v60 = vpop.f32.mrb[8].mxu0 }
 0x528   : > { %v1342_v61 = vadd.f32 %v1341_v60, %v3835_v20  ;;  %v3400_v62 = vpop.f32.mrb[9].mxu0 }
 0x52a   : > { %v1345_v63 = vsel %vm792_vm2, %v1342_v61, -inf }
 0x52b   : > { %1346 = vmax.xlane.f32.xlu1 %v1345_v63 }
 0x53c   : > { %1509 = vrot.lane.b32.xlu1 %v3816_v11, %s4176_s24  ;;  %s4206_s24 = smov 104  }
 0x540   : > { %1507 = vrot.lane.b32.xlu1 %v3816_v11, %s4178_s6  ;;  %s4200_s6 = sld [smem:[#allocation8_spill]] }
 0x546   : > { %v1786_v50 = vld [vmem:[%s4200_s6] sm:$0xff]  ;;  %v1787_v51 = vld [vmem:[%s4200_s6 + $0x8] sm:$0xff]  ;;  %v1788_v56 = vld [vmem:[%s4200_s6 + $0x10] sm:$0xff] }
 0x547   : > { %v3545_v53 = vpack.c.bf16 %v1787_v51, %v1786_v50  ;;  %v1789_v57 = vld [vmem:[%s4200_s6 + $0x18] sm:$0xff] }
 0x548   : > { %v3548_v59 = vpack.c.bf16 %v1789_v57, %v1788_v56 }
 0x5b8   : > { %v1347_v0 = vpop.xlane.xlu1 %1346 }
 0x5b9   : > { %v1348_v1 = vsub.f32 %v1342_v61, %v1347_v0  ;;  %v3245_v0 = vld [vmem:[%s4166_s16] ss:$0 sm:$0xff] }
 0x5bb   : > { %v1349_v2 = vmul.f32 1.442695, %v1348_v1 }
 0x5bc   : > { %v1510_v12 = vpop.permute.xlu1 %1509 }
 0x5bd   : > { %3605 = vpow2.f32 %v1349_v2  ;;  %v3246_v2 = vld [vmem:[%s4167_s17] ss:$0 sm:$0xff] }
 0x5c0   : > { %v1508_v14 = vpop.permute.xlu1 %1507 }
 0x5c7   : > { %v3606_v4 = vpop.eup %3605 }
 0x5c8   : > { %v1351_v5 = vsel %vm792_vm2, %v3606_v4, 0.0 }
 0x5c9   : > { %1352 = vadd.xlane.f32.xlu0 %v1351_v5 }
 0x5df   : > { %1356 = vrot.lane.b32.xlu0 %v3816_v11, %s3656_s27  ;;  %s4199_s27 = sld [smem:[#allocation7_spill]] }
 0x5e5   : > { %v3244_v37 = vld [vmem:[%s4199_s27] ss:$0 sm:$0xff]  ;;  %s4203_s27 = smov 88  }
 0x656   : > { %v1353_v7 = vpop.xlane.xlu0 %1352 }
 0x657   : > { %3607 = vrcp.f32 %v1353_v7  ;;  %v3249_v7 = vld [vmem:[%s4159_s9] ss:$0 sm:$0xff] }
 0x65a   : > { %v1357_v9 = vpop.permute.xlu0 %1356 }
 0x65b   : > { %3402 = vmatpush3.msra.mxu1 %v1357_v9 }
 0x65c   : > { %3411 = vmatprep.subr.mxu1 %v3645_v6 }
 0x661   : > { %v3608_v10 = vpop.eup %3607 }
 0x662   : > { %v1355_v13 = vmul.f32 %v3608_v10, %v3606_v4 }
 0x664   : > { %3404 = vmatmul.mubr.msk.f32.vlgmr.msra.gmra.mrb[6].mxu1 %vm792_vm2, %v1355_v13  ;;  %v3247_v13 = vld [vmem:[%s4157_s7] ss:$0 sm:$0xff] }
 0x665   : > { %3412 = vmatpush3.xpose.msk.msra.mxu1 %vm792_vm2, %v1510_v12  ;;  %3413 = vmatprep.mubr.msk.f32.mxu1 %vm3644_vm0, %v3645_v6 }
 0x666   : > { %3421 = vmatprep.subr.mxu1 %v3645_v6 }
 0x668   : > { %3414 = vmatmul.mubr.msk.f32.vlgmr.msra.gmra.mrb[8].mxu1 %vm792_vm2, %v1508_v14 }
 0x669   : > { %3423 = vmatprep.mubr.msk.f32.mxu1 %vm3644_vm0, %v3645_v6 }
 0x737   : > { %v1428_v16 = vpop.f32.mrb[6].mxu1 }
 0x738   : > { %v3405_v17 = vpop.f32.mrb[7].mxu1  ;;  %3409 = vmatmul.mubr.msk.f32.vlgmr.msra.gmra.mrb[10].mxu0 %vm792_vm2, %v1428_v16 }
 0x739   : > { %3418 = vmatprep.mubr.msk.f32.mxu0 %vm3644_vm0, %v3645_v6 }
 0x73b   : > { %v1581_v18 = vpop.f32.mrb[8].mxu1 }
 0x73c   : > { %v1582_v19 = vadd.f32 %v1581_v18, %v3835_v20  ;;  %v3415_v21 = vpop.f32.mrb[9].mxu1  ;;  %v1672_v20 = vld [vmem:[%s4198_s30 + $0x18] sm:$0xff]  ;;  %s695_s30 = scalar_lea.vmem %s4172_s22, %s3800_s25 }
 0x73d   : > { %3422 = vmatpush3.msra.mxu1 %v1672_v20 }
 0x73e   : > { %v1585_v22 = vsel %vm792_vm2, %v1582_v19, -inf  ;;  %3550 = vmatprep.subr.bf16.mxu1 %v3643_v3 }
 0x73f   : > { %1586 = vmax.xlane.f32.xlu0 %v1585_v22 }
 0x755   : > { %1596 = vrot.lane.b32.xlu0 %v3816_v11, %s3657_s0 }
 0x7cc   : > { %v1587_v23 = vpop.xlane.xlu0 %1586 }
 0x7cd   : > { %v1588_v24 = vsub.f32 %v1582_v19, %v1587_v23 }
 0x7cf   : > { %v1589_v25 = vmul.f32 1.442695, %v1588_v24 }
 0x7d0   : > { %v1597_v26 = vpop.permute.xlu0 %1596 }
 0x7d1   : > { %3609 = vpow2.f32 %v1589_v25  ;;  %3417 = vmatpush3.msra.mxu0 %v1597_v26 }
 0x7d2   : > { %3544 = vmatprep.subr.bf16.mxu0 %v3643_v3 }
 0x7db   : > { %v3610_v27 = vpop.eup %3609 }
 0x7dc   : > { %v1591_v28 = vsel %vm792_vm2, %v3610_v27, 0.0 }
 0x7dd   : > { %1592 = vadd.xlane.f32.xlu1 %v1591_v28 }
 0x80b   : > { %v1502_v11 = vpop.f32.mrb[10].mxu0 }
 0x80c   : > { %v1506_v29 = vadd.f32 %v1502_v11, %v3876_v58  ;;  %v3410_v30 = vpop.f32.mrb[11].mxu0  ;;  %v697_v58 = vld [vmem:[%s691_s26] sm:$0xff]  ;;  %s4208_s26 = smov 72  }
 0x86a   : > { %v1593_v31 = vpop.xlane.xlu1 %1592 }
 0x86b   : > { %3611 = vrcp.f32 %v1593_v31 }
 0x875   : > { %v3612_v32 = vpop.eup %3611 }
 0x876   : > { %v1595_v33 = vmul.f32 %v3612_v32, %v3610_v27 }
 0x878   : > { %3419 = vmatmul.mubr.msk.f32.vlgmr.msra.gmra.mrb[12].mxu0 %vm792_vm2, %v1595_v33 }
 0x879   : > { %3434 = vmatprep.mubr.msk.f32.mxu0 %vm3644_vm0, %v3645_v6  ;;  %3546 = vmatpush3.bf16.msra.mxu0 %v3545_v53 }
 0x87a   : > { %3547 = vmatprep.subr.bf16.mxu0 %v3643_v3 }
 0x87d   : > { %3549 = vmatpush3.bf16.msra.mxu0 %v3548_v59 }
 0x87e   : > { %3448 = vmatprep.subr.mxu0 %v3645_v6 }
 0x94b   : > { %v1668_v34 = vpop.f32.mrb[12].mxu0 }
 0x94c   : > { %v3420_v35 = vpop.f32.mrb[13].mxu0  ;;  %3424 = vmatmul.mubr.msk.f32.vlgmr.msra.gmra.mrb[10].mxu1 %vm792_vm2, %v1668_v34 }
 0x94d   : > { %3445 = vmatprep.mubr.msk.f32.mxu1 %vm3644_vm0, %v3645_v6 }
 0xa1f   : > { %v1742_v36 = vpop.f32.mrb[10].mxu1 }
 0xa20   : > { %v1746_v38 = vadd.f32 %v1742_v36, %v1506_v29  ;;  %v3425_v39 = vpop.f32.mrb[11].mxu1 }
 0xa22   : > { %v1754_v40 = vadd.f32 %v3244_v37, %v1746_v38 }
 0xa24   : > { %v1755_v41 = vadd.f32 %v1754_v40, %v3806_v8  ;;  %v3551_v8 = vpack.c.bf16 %v1871_v49, %v1870_v48 }
 0xa26   : > { %v1756_v42 = vsel %vm715_vm1, %v1755_v41, 0.0  ;;  %3552 = vmatpush3.bf16.msra.mxu1 %v3551_v8 }
 0xa27   : > { %1757 = vadd.xlane.f32.xlu1 %v1756_v42  ;;  %3553 = vmatprep.subr.bf16.mxu1 %v3643_v3  ;;  %v2117_v42 = vld [vmem:[%s4160_s10] sm:$0xff] }
 0xa2a   : > { %3555 = vmatpush3.bf16.msra.mxu1 %v3554_v55 }
 0xa2b   : > { %3453 = vmatprep.subr.mxu1 %v3645_v6 }
 0xa2d   : > { %3446 = vmatmul.mubr.msk.f32.vlgmr.msra.gmra.mrb[12].mxu1 %vm715_vm1, %v697_v58 }
 0xa2e   : > { %3455 = vmatprep.mubr.msk.f32.mxu1 %vm3644_vm0, %v3645_v6 }
 0xab4   : > { %v1758_v43 = vpop.xlane.xlu1 %1757 }
 0xab5   : > { %v1760_v44 = vmul.f32 0.03125, %v1758_v43  ;;  %v2283_v43 = vld [vmem:[%s4160_s10 + $0x8] sm:$0xff] }
 0xab7   : > { %v1761_v45 = vsub.f32 %v1755_v41, %v1760_v44 }
 0xab9   : > { %v1762_v46 = vmul.f32 %v1761_v45, %v1761_v45 }
 0xabb   : > { %v1763_v47 = vsel %vm715_vm1, %v1762_v46, 0.0 }
 0xabc   : > { %1764 = vadd.xlane.f32.xlu1 %v1763_v47 }
 0xb00   : > { %v1950_v9 = vpop.f32.mrb[12].mxu1 }
 0xb01   : > { %v3974_v10 = vadd.f32 %v3249_v7, %v1950_v9  ;;  %v3447_v12 = vpop.f32.mrb[13].mxu1  ;;  %v2595_v7 = vld [vmem:[%s4160_s10 + $0x10] sm:$0xff] }
 0xb03   : > { %2120 = vrot.lane.b32.xlu1 %v3974_v10, %s4202_s28 }
 0xb49   : > { %v1765_v60 = vpop.xlane.xlu1 %1764 }
 0xb4a   : > { %v1766_v61 = vmul.f32 0.03125, %v1765_v60 }
 0xb4c   : > { %v1767_v62 = vadd.f32 1e-05, %v1766_v61 }
 0xb4e   : > { %3613 = vrsqrt.f32 %v1767_v62 }
 0xb58   : > { %v3614_v63 = vpop.eup %3613 }
 0xb59   : > { %v1769_v1 = vmul.f32 %v3614_v63, %v1761_v45 }
 0xb5b   : > { %v1777_v4 = vmul.f32 %v3245_v0, %v1769_v1 }
 0xb5d   : > { %v3965_v5 = vadd.f32 %v3246_v2, %v1777_v4 }
 0xb5f   : > { %3435 = vmatmul.mubr.msk.f32.vlgmr.msra.gmra.mrb[14].mxu0 %vm715_vm1, %v3965_v5 }
 0xb60   : > { %3450 = vmatprep.mubr.msk.f32.mxu0 %vm3644_vm0, %v3645_v6  ;;  %3449 = vmatpush3.xpose.msk.msra.mxu0 %vm792_vm2, %v3974_v10 }
 0xb61   : > { %3458 = vmatprep.subr.mxu0 %v3645_v6 }
 0xb75   : > { %v2121_v17 = vpop.permute.xlu1 %2120 }
 0xc32   : > { %v1866_v14 = vpop.f32.mrb[14].mxu0 }
 0xc33   : > { %v3984_v15 = vadd.f32 %v3247_v13, %v1866_v14  ;;  %v3436_v16 = vpop.f32.mrb[15].mxu0 }
 0xc35   : > { %2118 = vrot.lane.b32.xlu0 %v3984_v15, %s4202_s28  ;;  %3451 = vmatmul.mubr.msk.f32.vlgmr.msra.gmra.mrb[16].mxu0 %vm792_vm2, %v3984_v15 }
 0xc36   : > { %3459 = vmatpush3.xpose.msk.msra.mxu0 %vm792_vm2, %v2121_v17  ;;  %3460 = vmatprep.mubr.msk.f32.mxu0 %vm3644_vm0, %v3645_v6 }
 0xc37   : > { %3468 = vmatprep.subr.mxu0 %v3645_v6 }
 0xca7   : > { %v2119_v18 = vpop.permute.xlu0 %2118 }
 0xca8   : > { %3461 = vmatmul.mubr.msk.f32.vlgmr.msra.gmra.mrb[18].mxu0 %vm792_vm2, %v2119_v18 }
 0xca9   : > { %3470 = vmatprep.mubr.msk.f32.mxu0 %vm3644_vm0, %v3645_v6  ;;  %3469 = vmatpush3.msra.mxu0 %v2283_v43  ;;  %v2951_v43 = vld [vmem:[%s4162_s12 + $0x18] sm:$0xff] }
 0xcaa   : > { %3478 = vmatprep.subr.mxu0 %v3645_v6 }
 0xd08   : > { %v2026_v19 = vpop.f32.mrb[16].mxu0 }
 0xd09   : > { %v3452_v21 = vpop.f32.mrb[17].mxu0  ;;  %v2030_v22 = vsel %vm792_vm2, %v2026_v19, -inf }
 0xd0a   : > { %2031 = vmax.xlane.f32.xlu0 %v2030_v22 }
 0xd7b   : > { %v2192_v23 = vpop.f32.mrb[18].mxu0 }
 0xd7c   : > { %v3462_v24 = vpop.f32.mrb[19].mxu0  ;;  %v2196_v25 = vsel %vm792_vm2, %v2192_v23, -inf }
 0xd7d   : > { %2197 = vmax.xlane.f32.xlu1 %v2196_v25 }
 0xd8e   : > { %2207 = vrot.lane.b32.xlu1 %v3974_v10, %s4203_s27 }
 0xd92   : > { %2432 = vrot.lane.b32.xlu1 %v3974_v10, %s4204_s1 }
 0xd97   : > { %v2032_v26 = vpop.xlane.xlu0 %2031 }
 0xd98   : > { %v2033_v27 = vsub.f32 %v2026_v19, %v2032_v26 }
 0xd9a   : > { %v2034_v28 = vmul.f32 1.442695, %v2033_v27 }
 0xd9c   : > { %3615 = vpow2.f32 %v2034_v28 }
 0xda6   : > { %v3616_v20 = vpop.eup %3615 }
 0xda7   : > { %v2036_v11 = vsel %vm792_vm2, %v3616_v20, 0.0 }
 0xda8   : > { %2037 = vadd.xlane.f32.xlu0 %v2036_v11 }
 0xe0a   : > { %v2198_v29 = vpop.xlane.xlu1 %2197 }
 0xe0b   : > { %v2199_v30 = vsub.f32 %v2192_v23, %v2198_v29  ;;  %v2835_v23 = vld [vmem:[%s4160_s10 + $0x18] sm:$0xff] }
 0xe0d   : > { %v2200_v31 = vmul.f32 1.442695, %v2199_v30  ;;  %v3267_v30 = vld [vmem:[%s4161_s11] ss:$0 sm:$0xff] }
 0xe0e   : > { %v2208_v39 = vpop.permute.xlu1 %2207 }
 0xe0f   : > { %3617 = vpow2.f32 %v2200_v31 }
 0xe12   : > { %v2433_v47 = vpop.permute.xlu1 %2432 }
 0xe19   : > { %v3618_v32 = vpop.eup %3617 }
 0xe1a   : > { %v2202_v33 = vsel %vm792_vm2, %v3618_v32, 0.0 }
 0xe1b   : > { %2203 = vadd.xlane.f32.xlu0 %v2202_v33 }
 0xe31   : > { %2041 = vrot.lane.b32.xlu0 %v3974_v10, %s4205_s2 }
 0xe35   : > { %2430 = vrot.lane.b32.xlu0 %v3984_v15, %s4204_s1  ;;  %v2038_v34 = vpop.xlane.xlu0 %2037 }
 0xe36   : > { %3619 = vrcp.f32 %v2038_v34 }
 0xe40   : > { %v3620_v36 = vpop.eup %3619 }
 0xe41   : > { %v2040_v37 = vmul.f32 %v3620_v36, %v3616_v20 }
 0xea8   : > { %v2204_v35 = vpop.xlane.xlu0 %2203 }
 0xea9   : > { %3621 = vrcp.f32 %v2204_v35 }
 0xeac   : > { %v2042_v38 = vpop.permute.xlu0 %2041 }
 0xead   : > { %3454 = vmatpush3.msra.mxu1 %v2042_v38 }
 0xeae   : > { %3456 = vmatmul.mubr.msk.f32.vlgmr.msra.gmra.mrb[14].mxu1 %vm792_vm2, %v2040_v37  ;;  %3463 = vmatprep.subr.mxu1 %v3645_v6 }
 0xeaf   : > { %3464 = vmatpush3.msra.mxu1 %v2208_v39  ;;  %3465 = vmatprep.mubr.msk.f32.mxu1 %vm3644_vm0, %v3645_v6 }
 0xeb0   : > { %3473 = vmatprep.subr.mxu1 %v3645_v6  ;;  %v2431_v49 = vpop.permute.xlu0 %2430 }
 0xeb3   : > { %v3622_v40 = vpop.eup %3621 }
 0xeb4   : > { %v2206_v41 = vmul.f32 %v3622_v40, %v3618_v32 }
 0xeb6   : > { %3466 = vmatmul.mubr.msk.f32.vlgmr.msra.gmra.mrb[16].mxu1 %vm792_vm2, %v2206_v41  ;;  %v2949_v41 = vld [vmem:[%s4162_s12 + $0x8] sm:$0xff] }
 0xeb7   : > { %3475 = vmatprep.mubr.msk.f32.mxu1 %vm3644_vm0, %v3645_v6  ;;  %3474 = vmatpush3.msra.mxu1 %v2117_v42 }
 0xeb8   : > { %3483 = vmatprep.subr.mxu1 %v3645_v6 }
 0xf81   : > { %v2113_v44 = vpop.f32.mrb[14].mxu1 }
 0xf82   : > { %v3457_v45 = vpop.f32.mrb[15].mxu1  ;;  %3476 = vmatmul.mubr.msk.f32.vlgmr.msra.gmra.mrb[18].mxu1 %vm792_vm2, %v2113_v44 }
 0xf83   : > { %3485 = vmatprep.mubr.msk.f32.mxu1 %vm3644_vm0, %v3645_v6  ;;  %v3033_v45 = vld [vmem:[%s4164_s14] sm:$0xff] }
 0xf89   : > { %v2279_v46 = vpop.f32.mrb[16].mxu1 }
 0xf8a   : > { %v3467_v48 = vpop.f32.mrb[17].mxu1  ;;  %3471 = vmatmul.mubr.msk.f32.vlgmr.msra.gmra.mrb[20].mxu0 %vm792_vm2, %v2279_v46  ;;  %v3034_v46 = vld [vmem:[%s4164_s14 + $0x8] sm:$0xff] }
 0xf8b   : > { %3479 = vmatpush3.xpose.msk.msra.mxu0 %vm792_vm2, %v2433_v47  ;;  %3480 = vmatprep.mubr.msk.f32.mxu0 %vm3644_vm0, %v3645_v6  ;;  %v3035_v47 = vld [vmem:[%s4164_s14 + $0x10] sm:$0xff]  ;;  %v3563_v48 = vpack.c.bf16 %v3034_v46, %v3033_v45 }
 0xf8c   : > { %3488 = vmatprep.subr.mxu0 %v3645_v6 }
 0xf8e   : > { %3481 = vmatmul.mubr.msk.f32.vlgmr.msra.gmra.mrb[22].mxu0 %vm792_vm2, %v2431_v49  ;;  %v3036_v49 = vld [vmem:[%s4164_s14 + $0x18] sm:$0xff] }
 0xf8f   : > { %3490 = vmatprep.mubr.msk.f32.mxu0 %vm3644_vm0, %v3645_v6  ;;  %3489 = vmatpush3.msra.mxu0 %v2595_v7 }
 0xf90   : > { %3498 = vmatprep.subr.mxu0 %v3645_v6 }
0x1055   : > { %v2426_v8 = vpop.f32.mrb[18].mxu1 }
0x1056   : > { %v3477_v50 = vpop.f32.mrb[19].mxu1 }
0x1057   : > { %v3037_v50 = vld [vmem:[%s4164_s14 + $0x20] sm:$0xff] }
0x105d   : > { %v2353_v51 = vpop.f32.mrb[20].mxu0 }
0x105e   : > { %v2427_v52 = vadd.f32 %v2426_v8, %v2353_v51  ;;  %v3472_v53 = vpop.f32.mrb[21].mxu0  ;;  %v3566_v8 = vpack.c.bf16 %v3036_v49, %v3035_v47  ;;  %v3038_v51 = vld [vmem:[%s4164_s14 + $0x28] sm:$0xff] }
0x1061   : > { %v2504_v54 = vpop.f32.mrb[22].mxu0 }
0x1062   : > { %v3482_v55 = vpop.f32.mrb[23].mxu0  ;;  %v2508_v56 = vsel %vm792_vm2, %v2504_v54, -inf }
0x1063   : > { %2509 = vmax.xlane.f32.xlu1 %v2508_v56 }
0x1074   : > { %2672 = vrot.lane.b32.xlu1 %v3974_v10, %s4206_s24 }
0x1078   : > { %2670 = vrot.lane.b32.xlu1 %v3984_v15, %s4206_s24 }
0x10f0   : > { %v2510_v57 = vpop.xlane.xlu1 %2509 }
0x10f1   : > { %v2511_v58 = vsub.f32 %v2504_v54, %v2510_v57  ;;  %v3268_v57 = vld [vmem:[%s4168_s18] ss:$0 sm:$0xff] }
0x10f3   : > { %v2512_v59 = vmul.f32 1.442695, %v2511_v58 }
0x10f4   : > { %v2673_v1 = vpop.permute.xlu1 %2672 }
0x10f5   : > { %3623 = vpow2.f32 %v2512_v59  ;;  %v3269_v59 = vld [vmem:[%s4169_s19] ss:$0 sm:$0xff] }
0x10f8   : > { %v2671_v4 = vpop.permute.xlu1 %2670 }
0x10ff   : > { %v3624_v60 = vpop.eup %3623 }
0x1100   : > { %v2514_v61 = vsel %vm792_vm2, %v3624_v60, 0.0 }
0x1101   : > { %2515 = vadd.xlane.f32.xlu0 %v2514_v61 }
0x1117   : > { %2519 = vrot.lane.b32.xlu0 %v3974_v10, %s4207_s29 }
0x118e   : > { %v2516_v62 = vpop.xlane.xlu0 %2515 }
0x118f   : > { %3625 = vrcp.f32 %v2516_v62  ;;  %v3040_v62 = vld [vmem:[%s4164_s14 + $0x38] sm:$0xff] }
0x1192   : > { %v2520_v63 = vpop.permute.xlu0 %2519 }
0x1193   : > { %3484 = vmatpush3.msra.mxu1 %v2520_v63 }
0x1194   : > { %3493 = vmatprep.subr.mxu1 %v3645_v6 }
0x1199   : > { %v3626_v0 = vpop.eup %3625 }
0x119a   : > { %v2518_v2 = vmul.f32 %v3626_v0, %v3624_v60  ;;  %v3270_v0 = vld [vmem:[%s4163_s13] ss:$0 sm:$0xff] }
0x119c   : > { %3486 = vmatmul.mubr.msk.f32.vlgmr.msra.gmra.mrb[20].mxu1 %vm792_vm2, %v2518_v2 }
0x119d   : > { %3494 = vmatpush3.xpose.msk.msra.mxu1 %vm792_vm2, %v2673_v1  ;;  %3495 = vmatprep.mubr.msk.f32.mxu1 %vm3644_vm0, %v3645_v6 }
0x119e   : > { %3503 = vmatprep.subr.mxu1 %v3645_v6 }
0x11a0   : > { %3496 = vmatmul.mubr.msk.f32.vlgmr.msra.gmra.mrb[22].mxu1 %vm792_vm2, %v2671_v4 }
0x11a1   : > { %3505 = vmatprep.mubr.msk.f32.mxu1 %vm3644_vm0, %v3645_v6  ;;  %3504 = vmatpush3.msra.mxu1 %v2835_v23 }
0x11a2   : > { %3562 = vmatprep.subr.bf16.mxu1 %v3643_v3 }
0x126f   : > { %v2591_v9 = vpop.f32.mrb[20].mxu1 }
0x1270   : > { %v3487_v12 = vpop.f32.mrb[21].mxu1  ;;  %3491 = vmatmul.mubr.msk.f32.vlgmr.msra.gmra.mrb[24].mxu0 %vm792_vm2, %v2591_v9  ;;  %v3272_v9 = vld [vmem:[%s4165_s15] ss:$0 sm:$0xff] }
0x1271   : > { %3500 = vmatprep.mubr.msk.f32.mxu0 %vm3644_vm0, %v3645_v6 }
0x1273   : > { %v2744_v13 = vpop.f32.mrb[22].mxu1 }
0x1274   : > { %v3497_v14 = vpop.f32.mrb[23].mxu1  ;;  %v2748_v15 = vsel %vm792_vm2, %v2744_v13, -inf }
0x1275   : > { %2749 = vmax.xlane.f32.xlu0 %v2748_v15 }
0x128b   : > { %2759 = vrot.lane.b32.xlu0 %v3974_v10, %s4208_s26 }
0x1302   : > { %v2750_v16 = vpop.xlane.xlu0 %2749 }
0x1303   : > { %v2751_v17 = vsub.f32 %v2744_v13, %v2750_v16 }
0x1305   : > { %v2752_v18 = vmul.f32 1.442695, %v2751_v17 }
0x1306   : > { %v2760_v19 = vpop.permute.xlu0 %2759 }
0x1307   : > { %3627 = vpow2.f32 %v2752_v18  ;;  %3499 = vmatpush3.msra.mxu0 %v2760_v19 }
0x1308   : > { %3556 = vmatprep.subr.bf16.mxu0 %v3643_v3 }
0x1311   : > { %v3628_v21 = vpop.eup %3627 }
0x1312   : > { %v2754_v22 = vsel %vm792_vm2, %v3628_v21, 0.0 }
0x1313   : > { %2755 = vadd.xlane.f32.xlu1 %v2754_v22 }
0x1343   : > { %v2665_v10 = vpop.f32.mrb[24].mxu0 }
0x1344   : > { %v2669_v24 = vadd.f32 %v2665_v10, %v2427_v52  ;;  %v3492_v25 = vpop.f32.mrb[25].mxu0  ;;  %v3569_v52 = vpack.c.bf16 %v3038_v51, %v3037_v50 }
0x13a0   : > { %v2756_v26 = vpop.xlane.xlu1 %2755 }
0x13a1   : > { %3629 = vrcp.f32 %v2756_v26  ;;  %v3274_v26 = vld [vmem:[%s4170_s20] ss:$0 sm:$0xff] }
0x13ab   : > { %v3630_v27 = vpop.eup %3629 }
0x13ac   : > { %v2758_v28 = vmul.f32 %v3630_v27, %v3628_v21 }
0x13ae   : > { %3501 = vmatmul.mubr.msk.f32.vlgmr.msra.gmra.mrb[26].mxu0 %vm792_vm2, %v2758_v28  ;;  %v3275_v28 = vld [vmem:[%s4171_s21] ss:$0 sm:$0xff] }
0x13af   : > { %3516 = vmatprep.mubr.msk.f32.mxu0 %vm3644_vm0, %v3645_v6 }
0x1481   : > { %v2831_v20 = vpop.f32.mrb[26].mxu0 }
0x1482   : > { %v3502_v11 = vpop.f32.mrb[27].mxu0  ;;  %3506 = vmatmul.mubr.msk.f32.vlgmr.msra.gmra.mrb[24].mxu1 %vm792_vm2, %v2831_v20 }
0x1483   : > { %3535 = vmatprep.mubr.msk.f32.mxu1 %vm3644_vm0, %v3645_v6  ;;  %v2948_v6 = vld [vmem:[%s4162_s12] sm:$0xff]  ;;  %3564 = vmatpush3.bf16.msra.mxu1 %v3563_v48 }
0x1484   : > { %v3557_v42 = vpack.c.bf16 %v2949_v41, %v2948_v6  ;;  %3565 = vmatprep.subr.bf16.mxu1 %v3643_v3 }
0x1486   : > { %3558 = vmatpush3.bf16.msra.mxu0 %v3557_v42 }
0x1487   : > { %3559 = vmatprep.subr.bf16.mxu0 %v3643_v3  ;;  %3567 = vmatpush3.bf16.msra.mxu1 %v3566_v8 }
0x1488   : > { %3568 = vmatprep.subr.bf16.mxu1 %v3643_v3 }
0x148b   : > { %3570 = vmatpush3.bf16.msra.mxu1 %v3569_v52 }
0x148c   : > { %3571 = vmatprep.subr.bf16.mxu1 %v3643_v3  ;;  %v3039_v3 = vld [vmem:[%s4164_s14 + $0x30] sm:$0xff] }
0x148d   : > { %v3572_v63 = vpack.c.bf16 %v3040_v62, %v3039_v3 }
0x148f   : > { %3573 = vmatpush3.bf16.msra.mxu1 %v3572_v63 }
0x1555   : > { %v2905_v29 = vpop.f32.mrb[24].mxu1 }
0x1556   : > { %v2909_v31 = vadd.f32 %v2905_v29, %v2669_v24  ;;  %v3507_v32 = vpop.f32.mrb[25].mxu1 }
0x1558   : > { %v2917_v33 = vadd.f32 %v3267_v30, %v2909_v31 }
0x155a   : > { %v2918_v34 = vadd.f32 %v2917_v33, %v3965_v5  ;;  %v2950_v5 = vld [vmem:[%s4162_s12 + $0x10] sm:$0xff] }
0x155b   : > { %v3560_v44 = vpack.c.bf16 %v2951_v43, %v2950_v5 }
0x155c   : > { %v2919_v35 = vsel %vm715_vm1, %v2918_v34, 0.0 }
0x155d   : > { %2920 = vadd.xlane.f32.xlu1 %v2919_v35  ;;  %3561 = vmatpush3.bf16.msra.mxu0 %v3560_v44 }
0x15ea   : > { %v2921_v36 = vpop.xlane.xlu1 %2920 }
0x15eb   : > { %v2922_v37 = vmul.f32 0.03125, %v2921_v36 }
0x15ed   : > { %v2923_v38 = vsub.f32 %v2918_v34, %v2922_v37 }
0x15ef   : > { %v2924_v39 = vmul.f32 %v2923_v38, %v2923_v38 }
0x15f1   : > { %v2925_v40 = vsel %vm715_vm1, %v2924_v39, 0.0 }
0x15f2   : > { %2926 = vadd.xlane.f32.xlu1 %v2925_v40 }
0x167f   : > { %v2927_v53 = vpop.xlane.xlu1 %2926 }
0x1680   : > { %v2928_v54 = vmul.f32 0.03125, %v2927_v53 }
0x1682   : > { %v2929_v55 = vadd.f32 1e-05, %v2928_v54 }
0x1684   : > { %3631 = vrsqrt.f32 %v2929_v55 }
0x168e   : > { %v3632_v56 = vpop.eup %3631 }
0x168f   : > { %v2931_v58 = vmul.f32 %v3632_v56, %v2923_v38 }
0x1691   : > { %v2939_v60 = vmul.f32 %v3268_v57, %v2931_v58 }
0x1693   : > { %v2947_v61 = vadd.f32 %v3269_v59, %v2939_v60 }
0x1695   : > { %3517 = vmatmul.mubr.msk.f32.vlgmr.msra.gmra.mrb[28].mxu0 %vm715_vm1, %v2947_v61 }
0x1768   : > { %v3028_v1 = vpop.f32.mrb[28].mxu0 }
0x1769   : > { %v3029_v2 = vadd.f32 %v3270_v0, %v3028_v1  ;;  %v3518_v4 = vpop.f32.mrb[29].mxu0 }
0x176b   : > { %v3032_v7 = vmax.f32 %v3029_v2, 0.0 }
0x176d   : > { %3536 = vmatmul.mubr.msk.f32.vlgmr.msra.gmra.mrb[26].mxu1 %vm3048_vm4, %v3032_v7 }
0x1840   : > { %v3118_v12 = vpop.f32.mrb[26].mxu1 }
0x1841   : > { %v3119_v13 = vadd.f32 %v3272_v9, %v3118_v12  ;;  %v3537_v14 = vpop.f32.mrb[27].mxu1 }
0x1843   : > { %v3122_v15 = vadd.f32 %v3119_v13, %v2947_v61 }
0x1845   : > { %v3123_v16 = vsel %vm715_vm1, %v3122_v15, 0.0 }
0x1846   : > { %3124 = vadd.xlane.f32.xlu1 %v3123_v16 }
0x18d3   : > { %v3125_v17 = vpop.xlane.xlu1 %3124 }
0x18d4   : > { %v3126_v18 = vmul.f32 0.03125, %v3125_v17 }
0x18d6   : > { %v3127_v19 = vsub.f32 %v3122_v15, %v3126_v18 }
0x18d8   : > { %v3128_v21 = vmul.f32 %v3127_v19, %v3127_v19 }
0x18da   : > { %v3129_v22 = vsel %vm715_vm1, %v3128_v21, 0.0 }
0x18db   : > { %3130 = vadd.xlane.f32.xlu1 %v3129_v22 }
0x1968   : > { %v3131_v23 = vpop.xlane.xlu1 %3130 }
0x1969   : > { %v3132_v10 = vmul.f32 0.03125, %v3131_v23 }
0x196b   : > { %v3133_v24 = vadd.f32 1e-05, %v3132_v10 }
0x196d   : > { %3633 = vrsqrt.f32 %v3133_v24 }
0x1977   : > { %v3634_v25 = vpop.eup %3633 }
0x1978   : > { %v3135_v27 = vmul.f32 %v3634_v25, %v3127_v19 }
0x197a   : > { %v3143_v20 = vmul.f32 %v3274_v26, %v3135_v27 }
0x197c   : > { %v3151_v11 = vadd.f32 %v3275_v28, %v3143_v20 }
0x197e   : > { %3152 = vst.msk [vmem:[%s695_s30] sm:$0xff] %vm715_vm1, %v3151_v11 }
0x197f PF: > { %s32_s3 = sadd.s32 1, %s3641_s3  }
0x1980   : > { %p29_p4 = scmp.ge.s32.totalorder %s32_s3, 4  }
0x1982   :  { %31 = sbr.rel (!%p29_p4) target bundleno = 8 (0x8), region = 141 }

</bundles_post_ra>
